<compile_context>
chip_gen: v7x
topology: tpu7x:2x2x1
jax: 0.10.0
libtpu: 0.0.40
codegen_flags: <defaults>
</compile_context>

<pallas_src>
import functools

import numpy as np
import jax
import jax.numpy as jnp
from jax.experimental import pallas as pl
from jax.experimental.pallas import tpu as pltpu


# ---------------------------------------------------------------------------
# Fixed bilinear demosaic filter (identical to the PyTorch reference).
# ---------------------------------------------------------------------------
_F_R = np.array([[1., 2., 1.], [2., 4., 2.], [1., 2., 1.]], np.float32) / 4.0
_F_G = np.array([[0., 1., 0.], [1., 4., 1.], [0., 1., 0.]], np.float32) / 4.0
BILINEAR_FILTER = np.stack([_F_R, _F_G, _F_R])            # (3, 3, 3), groups=3

# Vertical halo offset inside the conv scratch plane; a multiple of 8 keeps the
# interior-row store sublane-tile aligned (no rotations, no masked stores).
_PAD_S = 8


def _packed_band_matrices(filt, W):
    """Fold the horizontal taps of a depthwise 3x3 filter into channel-packed
    block-diagonal band matrices.

    Returns B of shape (3, C*W, C*W) with
        B[i, c*W + q, c*W + out] = filt[c, i, q - out + 1]   for |q - out| <= 1
    so that for a channel-packed row x of shape (H, C*W):
        (x @ B[i])[r, c*W + out] = sum_j filt[c, i, j] * x[r, c*W + out + j - 1]
    with exact zero boundary handling along W (out-of-range columns are simply
    absent from the band) and no cross-channel leakage (block diagonal).
    """
    filt = np.asarray(filt, np.float32)
    C = filt.shape[0]
    CW = C * W
    B = np.zeros((3, CW, CW), np.float32)
    cols = np.arange(W)
    for i in range(3):
        for c in range(C):
            for j in range(3):
                rows = cols + (j - 1)
                valid = (rows >= 0) & (rows < W)
                B[i, c * W + rows[valid], c * W + cols[valid]] = filt[c, i, j]
    return B


# ---------------------------------------------------------------------------
# In-kernel helpers
# ---------------------------------------------------------------------------
def _conv3x3_packed(net_s, plane, band_ref, H):
    """Depthwise 3x3 cross-correlation (zero padding = 1) of a channel-packed
    (H, C*W) plane.

    Vertical taps: 3 sublane-shifted, full-width slices of the zero-halo
    scratch `net_s` (only its tile-aligned interior rows are rewritten, so the
    1-row halo above/below the image stays exactly zero).
    Horizontal taps + per-channel filter: block-diagonal (C*W, C*W) band
    matrices on the MXU, default precision, f32 accumulation.
    """
    net_s[_PAD_S:_PAD_S + H, :] = plane
    acc = None
    for i in range(3):
        row = net_s[_PAD_S - 1 + i:_PAD_S - 1 + i + H, :]
        term = jnp.dot(row, band_ref[i], preferred_element_type=jnp.float32)
        acc = term if acc is None else acc + term
    return acc


def _mmnet_fused_kernel(scal_ref, mosaic_ref, omm_ref, bilb_ref, denb_ref,
                        out_ref, net_s, *, H, max_iter, do_init):
    """Bilinear init + all TBPTT iterations for one image, channel-packed."""
    # Zero the halo scratch once per image; only its aligned interior rows are
    # rewritten afterwards, so the conv halo rows stay exactly zero.
    net_s[...] = jnp.zeros_like(net_s)

    # ---- init: xcur = bilinear(mosaic) (or mosaic itself), xpre = 0 ----------
    if do_init:
        xc = _conv3x3_packed(net_s, mosaic_ref[0], bilb_ref, H)
    else:
        xc = mosaic_ref[0]
    xp = jnp.zeros_like(xc)

    # ---- TBPTT recursion, fully unrolled; xc / xp stay vreg-resident ---------
    for k in range(max_iter):
        ew = scal_ref[2 * k]           # exp(w_k)               (0.0 for k == 0)
        sc = scal_ref[2 * k + 1]       # exp(alpha_k) * noise_sigma
        yk = xc + ew * (xc - xp)
        # net_input = yk - (M*yk - mosaic) == (1 - M)*yk + mosaic
        net = omm_ref[0] * yk + mosaic_ref[0]
        conv = _conv3x3_packed(net_s, net, denb_ref, H)
        xp = xc
        xc = jnp.clip(net - sc * conv, 0.0, 255.0)

    out_ref[0] = xc


def _mmnet_step_kernel(scal_ref, xcur_ref, xpre_ref, mosaic_ref, omm_ref,
                       denb_ref, out_ref, net_s, *, H):
    """Single MMNet iteration (used by the API-parity forward())."""
    net_s[...] = jnp.zeros_like(net_s)
    xc = xcur_ref[0]
    yk = xc + scal_ref[0] * (xc - xpre_ref[0])
    net = omm_ref[0] * yk + mosaic_ref[0]
    conv = _conv3x3_packed(net_s, net, denb_ref, H)
    out_ref[0] = jnp.clip(net - scal_ref[1] * conv, 0.0, 255.0)


def _bilinear_kernel(mosaic_ref, bilb_ref, out_ref, net_s, *, H):
    net_s[...] = jnp.zeros_like(net_s)
    out_ref[0] = _conv3x3_packed(net_s, mosaic_ref[0], bilb_ref, H)


# ---------------------------------------------------------------------------
# Layout plumbing (outside the kernel): (N, C, H, W) <-> lane-dense (N, H, C*W)
# ---------------------------------------------------------------------------
def _pack_nchw(x):
    N, C, H, W = x.shape
    return jnp.transpose(x, (0, 2, 1, 3)).reshape(N, H, C * W)


def _unpack_nchw(x, C, W):
    N, H, CW = x.shape
    return jnp.transpose(x.reshape(N, H, C, W), (0, 2, 1, 3))


def _slab_spec(H, CW):
    return pl.BlockSpec((1, H, CW), lambda n: (n, 0, 0))


def _band_spec(CW):
    return pl.BlockSpec((3, CW, CW), lambda n: (0, 0, 0))


def _halo_scratch(H, CW):
    return pltpu.VMEM((H + 2 * _PAD_S, CW), jnp.float32)


# ---------------------------------------------------------------------------
# Wrappers
# ---------------------------------------------------------------------------
def bilinear_pallas(mosaic):
    """Equivalent of bilinear() (demosaic init).
    # TODO(synk): the PyTorch bilinear() mutates its argument in place with
    # `/= 255`; JAX arrays are immutable, so forward_all_iter rescales mosaic
    # itself before feeding the fused kernel.
    """
    N, C, H, W = mosaic.shape
    assert C == 3
    CW = C * W
    scaled = jnp.where(jnp.max(mosaic) > 1.0, mosaic / 255.0, mosaic)
    bil_bands = jnp.asarray(_packed_band_matrices(BILINEAR_FILTER, W))
    kernel = functools.partial(_bilinear_kernel, H=H)
    out = pl.pallas_call(
        kernel,
        out_shape=jax.ShapeDtypeStruct((N, H, CW), jnp.float32),
        grid=(N,),
        in_specs=[_slab_spec(H, CW), _band_spec(CW)],
        out_specs=_slab_spec(H, CW),
        scratch_shapes=[_halo_scratch(H, CW)],
        compiler_params=pltpu.CompilerParams(dimension_semantics=("parallel",)),
    )(_pack_nchw(scaled), bil_bands)
    return _unpack_nchw(out, C, W)


class MMNetPallas:
    """JAX / Pallas-TPU port of MMNet's forward / forward_all_iter.

    The inner learned denoiser `model` is an external constructor argument in
    the PyTorch code with no definition in the reference file; it is substituted
    by a deterministic synthetic residual denoiser:
        model(x, sigma, alpha_k) := exp(alpha_k) * sigma * depthwise_conv3x3(x).
    """
    # TODO(synk): the real `self.model` denoiser network has no definition in
    # the reference file; a deterministic depthwise-conv denoiser is used.

    def __init__(self, denoiser_filter, max_iter=10, sigma_max=2, sigma_min=1):
        self.max_iter = max_iter
        self.alpha = np.linspace(np.log(sigma_max), np.log(sigma_min),
                                 max_iter).astype(np.float32)
        iters = np.arange(max_iter).astype(np.float64)
        iters[0] = 1
        self.w = np.log(iters / (iters + 3.0)).astype(np.float32)
        self.denoiser_filter = np.asarray(denoiser_filter, np.float32)  # (3,3,3)
        self._jit_cache = {}

    # Per-iteration scalars [exp(w_k), exp(alpha_k)*sigma], flattened for SMEM.
    # ew[0] is forced to 0.0 because the PyTorch forward() skips the momentum
    # extrapolation entirely for k == 0 (yk = xcur), regardless of w[0].
    def _scal_array(self, noise_sigma, max_iter):
        ew = np.exp(self.w[:max_iter]).astype(np.float32)
        ew[0] = 0.0
        sc = (np.exp(self.alpha[:max_iter]) *
              np.float32(noise_sigma)).astype(np.float32)
        return np.stack([ew, sc], axis=1).reshape(-1)        # (2 * max_iter,)

    def _fused_call(self, scal, mosaic_p, omm_p, bil_bands, den_bands,
                    do_init, max_iter, H, CW):
        N = mosaic_p.shape[0]
        kernel = functools.partial(_mmnet_fused_kernel, H=H,
                                   max_iter=max_iter, do_init=do_init)
        return pl.pallas_call(
            kernel,
            out_shape=jax.ShapeDtypeStruct((N, H, CW), jnp.float32),
            grid=(N,),
            in_specs=[pl.BlockSpec(memory_space=pltpu.MemorySpace.SMEM),
                      _slab_spec(H, CW), _slab_spec(H, CW),
                      _band_spec(CW), _band_spec(CW)],
            out_specs=_slab_spec(H, CW),
            scratch_shapes=[_halo_scratch(H, CW)],
            compiler_params=pltpu.CompilerParams(
                dimension_semantics=("parallel",)),
        )(scal, mosaic_p, omm_p, bil_bands, den_bands)

    def _run_all(self, scal, mosaic, M, *, do_init, max_iter):
        N, C, H, W = mosaic.shape
        assert C == 3
        if do_init:
            # mirrors bilinear()'s in-place `/= 255` (which also rescales the
            # mosaic used by every iteration) without any host sync.
            mosaic = jnp.where(jnp.max(mosaic) > 1.0, mosaic / 255.0, mosaic)
        mos_p = _pack_nchw(mosaic)
        omm_p = _pack_nchw(1.0 - M)
        bil_bands = jnp.asarray(_packed_band_matrices(BILINEAR_FILTER, W))
        den_bands = jnp.asarray(_packed_band_matrices(self.denoiser_filter, W))
        out = self._fused_call(scal, mos_p, omm_p, bil_bands, den_bands,
                               do_init, max_iter, H, C * W)
        return _unpack_nchw(out, C, W)

    def forward(self, xcur, xpre, mosaic, M, noise_sigma, k):
        """Single MMNet iteration (API parity with the PyTorch forward)."""
        N, C, H, W = xcur.shape
        assert C == 3
        CW = C * W
        ew = float(np.exp(self.w[k])) if k > 0 else 0.0
        sc = float(np.exp(self.alpha[k])) * float(noise_sigma)
        scal = jnp.asarray([ew, sc], dtype=jnp.float32)
        xpre_arr = jnp.broadcast_to(jnp.asarray(xpre, jnp.float32), xcur.shape)
        den_bands = jnp.asarray(_packed_band_matrices(self.denoiser_filter, W))
        kernel = functools.partial(_mmnet_step_kernel, H=H)
        out = pl.pallas_call(
            kernel,
            out_shape=jax.ShapeDtypeStruct((N, H, CW), jnp.float32),
            grid=(N,),
            in_specs=[pl.BlockSpec(memory_space=pltpu.MemorySpace.SMEM)]
                     + [_slab_spec(H, CW)] * 4 + [_band_spec(CW)],
            out_specs=_slab_spec(H, CW),
            scratch_shapes=[_halo_scratch(H, CW)],
            compiler_params=pltpu.CompilerParams(
                dimension_semantics=("parallel",)),
        )(scal, _pack_nchw(xcur), _pack_nchw(xpre_arr),
          _pack_nchw(mosaic), _pack_nchw(1.0 - M), den_bands)
        return _unpack_nchw(out, C, W), xcur

    def forward_all_iter(self, mosaic, M, init, noise_estimation, max_iter=None):
        if max_iter is None:
            max_iter = self.max_iter
        if noise_estimation:
            # TODO(synk): pydlutil.wmad_estimator is an external dependency;
            # noise estimation is not implemented (L falls back to 1).
            L = 1.0
        else:
            L = 1.0
        scal = jnp.asarray(self._scal_array(L, max_iter))
        key = (bool(init), int(max_iter))
        fn = self._jit_cache.get(key)
        if fn is None:
            fn = jax.jit(functools.partial(self._run_all, do_init=bool(init),
                                           max_iter=int(max_iter)))
            self._jit_cache[key] = fn
        return fn(scal, mosaic, M)


# ---------------------------------------------------------------------------
# Pure-JAX reference (mirrors the PyTorch recursion) for self-verification.
# ---------------------------------------------------------------------------
def _ref_dwconv3x3(x, filt):
    N, C, H, W = x.shape
    xp = jnp.pad(x, ((0, 0), (0, 0), (1, 1), (1, 1)))
    chans = []
    for c in range(C):
        acc = jnp.zeros((N, H, W), x.dtype)
        for i in range(3):
            for j in range(3):
                acc = acc + float(filt[c, i, j]) * xp[:, c, i:i + H, j:j + W]
        chans.append(acc)
    return jnp.stack(chans, axis=1)


def _ref_forward_all_iter(mosaic, M, dfilt, scal, do_init, max_iter):
    if do_init:
        mosaic = jnp.where(jnp.max(mosaic) > 1.0, mosaic / 255.0, mosaic)
        xcur = _ref_dwconv3x3(mosaic, BILINEAR_FILTER)
    else:
        xcur = mosaic
    xpre = jnp.zeros_like(xcur)
    for k in range(max_iter):
        ew = float(scal[2 * k])
        sc = float(scal[2 * k + 1])
        yk = xcur + ew * (xcur - xpre)
        net = yk - (M * yk - mosaic)
        model_out = sc * _ref_dwconv3x3(net, dfilt)
        xpre = xcur
        xcur = jnp.clip(net - model_out, 0.0, 255.0)
    return xcur


if __name__ == "__main__":
    key = jax.random.PRNGKey(0)
    k_img, k_filt = jax.random.split(key)

    N, C, H, W = 2, 3, 16, 16

    # Bayer (RGGB) sampling mask M.
    Mn = np.zeros((N, C, H, W), np.float32)
    Mn[:, 0, 0::2, 0::2] = 1.0   # R
    Mn[:, 1, 0::2, 1::2] = 1.0   # G
    Mn[:, 1, 1::2, 0::2] = 1.0   # G
    Mn[:, 2, 1::2, 1::2] = 1.0   # B
    M = jnp.asarray(Mn)

    img = jax.random.uniform(k_img, (N, C, H, W), dtype=jnp.float32)  # in [0,1]
    mosaic = img * M

    # Deterministic synthetic denoiser filter (stands in for `model` weights),
    # rounded to bf16 so the default-precision MXU matmuls and the f32
    # reference use bit-identical filter taps.
    denoiser_filter = np.asarray(
        jnp.asarray(0.05 * jax.random.normal(k_filt, (3, 3, 3),
                                             dtype=jnp.float32),
                    jnp.bfloat16).astype(jnp.float32))

    net = MMNetPallas(denoiser_filter, max_iter=10, sigma_max=2, sigma_min=1)

    out = net.forward_all_iter(mosaic, M, init=True, noise_estimation=False)
    out = jax.block_until_ready(out)
    assert out.shape == (N, C, H, W) and out.dtype == jnp.float32

    # Tolerance reflects default-precision (bf16-operand) MXU matmuls fused
    # across 10 TBPTT iterations; the f32 reference runs at full precision.
    TOL = 1e-2

    # Verify the fused kernel against a pure-JAX reference of the recursion.
    scal_np = net._scal_array(1.0, net.max_iter)
    ref = _ref_forward_all_iter(mosaic, M, net.denoiser_filter, scal_np,
                                True, net.max_iter)
    np.testing.assert_allclose(np.asarray(out), np.asarray(ref),
                               rtol=TOL, atol=TOL)

    # Exercise the standalone bilinear demosaic and the single-step forward.
    demosaic = jax.block_until_ready(bilinear_pallas(mosaic))
    ref_demosaic = _ref_dwconv3x3(mosaic, BILINEAR_FILTER)
    np.testing.assert_allclose(np.asarray(demosaic), np.asarray(ref_demosaic),
                               rtol=TOL, atol=TOL)

    x1, x0 = net.forward(demosaic, 0, mosaic, M, 1.0, 0)
    x1 = jax.block_until_ready(x1)
    assert x1.shape == (N, C, H, W) and x0.shape == (N, C, H, W)
    ref_net0 = (1.0 - M) * demosaic + mosaic          # k == 0: yk = xcur
    ref_x1 = jnp.clip(ref_net0 - float(np.exp(net.alpha[0])) *
                      _ref_dwconv3x3(ref_net0, net.denoiser_filter), 0.0, 255.0)
    np.testing.assert_allclose(np.asarray(x1), np.asarray(ref_x1),
                               rtol=TOL, atol=TOL)

    print("KERNEL_OK")
</pallas_src>

<mosaic_0001>
module attributes {stable_mosaic.version = 11 : i64} {
  func.func @_mmnet_fused_kernel(%arg0: i32, %arg1: memref<20xf32, #tpu.memory_space<smem>>, %arg2: memref<1x16x48xf32, #tpu.memory_space<vmem>>, %arg3: memref<1x16x48xf32, #tpu.memory_space<vmem>>, %arg4: memref<3x48x48xf32, #tpu.memory_space<vmem>>, %arg5: memref<3x48x48xf32, #tpu.memory_space<vmem>>, %arg6: memref<1x16x48xf32, #tpu.memory_space<vmem>>, %arg7: memref<32x48xf32, #tpu.memory_space<vmem>>) attributes {dimension_semantics = [#tpu.dimension_semantics<parallel>], iteration_bounds = array<i64: 2>, scalar_prefetch = 0 : i64, scratch_operands = 1 : i64, tpu.core_type = #tpu.core_type<tc>, window_params = [{transform_indices = @transform_0, window_bounds = array<i64: 20>}, {transform_indices = @transform_1, window_bounds = array<i64: 1, 16, 48>}, {transform_indices = @transform_2, window_bounds = array<i64: 1, 16, 48>}, {pipeline_mode = #tpu.pipeline_mode<synchronous>, transform_indices = @transform_3, window_bounds = array<i64: 3, 48, 48>}, {pipeline_mode = #tpu.pipeline_mode<synchronous>, transform_indices = @transform_4, window_bounds = array<i64: 3, 48, 48>}, {transform_indices = @transform_5, window_bounds = array<i64: 1, 16, 48>}]} {
    %cst = arith.constant 0.000000e+00 : f32
    %0 = vector.broadcast %cst : f32 to vector<32x48xf32>
    %c0 = arith.constant 0 : index
    %c0_0 = arith.constant 0 : index
    %1 = vector.load %arg7[%c0, %c0_0] : memref<32x48xf32, #tpu.memory_space<vmem>>, vector<32x48xf32>
    tpu.vector_store %arg7[%c0, %c0_0], %0 {strides = array<i32>} : memref<32x48xf32, #tpu.memory_space<vmem>>, vector<32x48xf32>,
    %c0_1 = arith.constant 0 : index
    %c0_2 = arith.constant 0 : index
    %c0_3 = arith.constant 0 : index
    %2 = vector.load %arg2[%c0_1, %c0_2, %c0_3] : memref<1x16x48xf32, #tpu.memory_space<vmem>>, vector<1x16x48xf32>
    %3 = vector.shape_cast %2 : vector<1x16x48xf32> to vector<16x48xf32>
    %c8 = arith.constant 8 : index
    %c0_4 = arith.constant 0 : index
    %4 = vector.load %arg7[%c8, %c0_4] : memref<32x48xf32, #tpu.memory_space<vmem>>, vector<16x48xf32>
    tpu.vector_store %arg7[%c8, %c0_4], %3 {strides = array<i32>} : memref<32x48xf32, #tpu.memory_space<vmem>>, vector<16x48xf32>,
    %c7 = arith.constant 7 : index
    %c0_5 = arith.constant 0 : index
    %5 = vector.load %arg7[%c7, %c0_5] : memref<32x48xf32, #tpu.memory_space<vmem>>, vector<16x48xf32>
    %c0_6 = arith.constant 0 : index
    %c0_7 = arith.constant 0 : index
    %c0_8 = arith.constant 0 : index
    %6 = vector.load %arg4[%c0_6, %c0_7, %c0_8] : memref<3x48x48xf32, #tpu.memory_space<vmem>>, vector<1x48x48xf32>
    %7 = vector.shape_cast %6 : vector<1x48x48xf32> to vector<48x48xf32>
    %cst_9 = arith.constant dense<0.000000e+00> : vector<16x48xf32>
    %8 = tpu.matmul %5, %7, %cst_9 {dimension_numbers = #tpu.dot_dimension_numbers<[1], [0], [0], [1], [0, 0, 1, 1], [], []>} : vector<16x48xf32>, vector<48x48xf32>, vector<16x48xf32> -> vector<16x48xf32>
    %c8_10 = arith.constant 8 : index
    %c0_11 = arith.constant 0 : index
    %9 = vector.load %arg7[%c8_10, %c0_11] : memref<32x48xf32, #tpu.memory_space<vmem>>, vector<16x48xf32>
    %c1 = arith.constant 1 : index
    %c0_12 = arith.constant 0 : index
    %c0_13 = arith.constant 0 : index
    %10 = vector.load %arg4[%c1, %c0_12, %c0_13] : memref<3x48x48xf32, #tpu.memory_space<vmem>>, vector<1x48x48xf32>
    %11 = vector.shape_cast %10 : vector<1x48x48xf32> to vector<48x48xf32>
    %cst_14 = arith.constant dense<0.000000e+00> : vector<16x48xf32>
    %12 = tpu.matmul %9, %11, %cst_14 {dimension_numbers = #tpu.dot_dimension_numbers<[1], [0], [0], [1], [0, 0, 1, 1], [], []>} : vector<16x48xf32>, vector<48x48xf32>, vector<16x48xf32> -> vector<16x48xf32>
    %13 = arith.addf %8, %12 : vector<16x48xf32>
    %c9 = arith.constant 9 : index
    %c0_15 = arith.constant 0 : index
    %14 = vector.load %arg7[%c9, %c0_15] : memref<32x48xf32, #tpu.memory_space<vmem>>, vector<16x48xf32>
    %c2 = arith.constant 2 : index
    %c0_16 = arith.constant 0 : index
    %c0_17 = arith.constant 0 : index
    %15 = vector.load %arg4[%c2, %c0_16, %c0_17] : memref<3x48x48xf32, #tpu.memory_space<vmem>>, vector<1x48x48xf32>
    %16 = vector.shape_cast %15 : vector<1x48x48xf32> to vector<48x48xf32>
    %cst_18 = arith.constant dense<0.000000e+00> : vector<16x48xf32>
    %17 = tpu.matmul %14, %16, %cst_18 {dimension_numbers = #tpu.dot_dimension_numbers<[1], [0], [0], [1], [0, 0, 1, 1], [], []>} : vector<16x48xf32>, vector<48x48xf32>, vector<16x48xf32> -> vector<16x48xf32>
    %18 = arith.addf %13, %17 : vector<16x48xf32>
    %cst_19 = arith.constant 0.000000e+00 : f32
    %19 = vector.broadcast %cst_19 : f32 to vector<16x48xf32>
    %c0_20 = arith.constant 0 : index
    %20 = memref.load %arg1[%c0_20] : memref<20xf32, #tpu.memory_space<smem>>
    %c1_21 = arith.constant 1 : index
    %21 = memref.load %arg1[%c1_21] : memref<20xf32, #tpu.memory_space<smem>>
    %22 = arith.subf %18, %19 : vector<16x48xf32>
    %23 = vector.broadcast %20 : f32 to vector<16x48xf32>
    %24 = arith.mulf %23, %22 : vector<16x48xf32>
    %25 = arith.addf %18, %24 : vector<16x48xf32>
    %c0_22 = arith.constant 0 : index
    %c0_23 = arith.constant 0 : index
    %c0_24 = arith.constant 0 : index
    %26 = vector.load %arg3[%c0_22, %c0_23, %c0_24] : memref<1x16x48xf32, #tpu.memory_space<vmem>>, vector<1x16x48xf32>
    %27 = vector.shape_cast %26 : vector<1x16x48xf32> to vector<16x48xf32>
    %28 = arith.mulf %27, %25 : vector<16x48xf32>
    %c0_25 = arith.constant 0 : index
    %c0_26 = arith.constant 0 : index
    %c0_27 = arith.constant 0 : index
    %29 = vector.load %arg2[%c0_25, %c0_26, %c0_27] : memref<1x16x48xf32, #tpu.memory_space<vmem>>, vector<1x16x48xf32>
    %30 = vector.shape_cast %29 : vector<1x16x48xf32> to vector<16x48xf32>
    %31 = arith.addf %28, %30 : vector<16x48xf32>
    %c8_28 = arith.constant 8 : index
    %c0_29 = arith.constant 0 : index
    %32 = vector.load %arg7[%c8_28, %c0_29] : memref<32x48xf32, #tpu.memory_space<vmem>>, vector<16x48xf32>
    tpu.vector_store %arg7[%c8_28, %c0_29], %31 {strides = array<i32>} : memref<32x48xf32, #tpu.memory_space<vmem>>, vector<16x48xf32>,
    %c7_30 = arith.constant 7 : index
    %c0_31 = arith.constant 0 : index
    %33 = vector.load %arg7[%c7_30, %c0_31] : memref<32x48xf32, #tpu.memory_space<vmem>>, vector<16x48xf32>
    %c0_32 = arith.constant 0 : index
    %c0_33 = arith.constant 0 : index
    %c0_34 = arith.constant 0 : index
    %34 = vector.load %arg5[%c0_32, %c0_33, %c0_34] : memref<3x48x48xf32, #tpu.memory_space<vmem>>, vector<1x48x48xf32>
    %35 = vector.shape_cast %34 : vector<1x48x48xf32> to vector<48x48xf32>
    %cst_35 = arith.constant dense<0.000000e+00> : vector<16x48xf32>
    %36 = tpu.matmul %33, %35, %cst_35 {dimension_numbers = #tpu.dot_dimension_numbers<[1], [0], [0], [1], [0, 0, 1, 1], [], []>} : vector<16x48xf32>, vector<48x48xf32>, vector<16x48xf32> -> vector<16x48xf32>
    %c8_36 = arith.constant 8 : index
    %c0_37 = arith.constant 0 : index
    %37 = vector.load %arg7[%c8_36, %c0_37] : memref<32x48xf32, #tpu.memory_space<vmem>>, vector<16x48xf32>
    %c1_38 = arith.constant 1 : index
    %c0_39 = arith.constant 0 : index
    %c0_40 = arith.constant 0 : index
    %38 = vector.load %arg5[%c1_38, %c0_39, %c0_40] : memref<3x48x48xf32, #tpu.memory_space<vmem>>, vector<1x48x48xf32>
    %39 = vector.shape_cast %38 : vector<1x48x48xf32> to vector<48x48xf32>
    %cst_41 = arith.constant dense<0.000000e+00> : vector<16x48xf32>
    %40 = tpu.matmul %37, %39, %cst_41 {dimension_numbers = #tpu.dot_dimension_numbers<[1], [0], [0], [1], [0, 0, 1, 1], [], []>} : vector<16x48xf32>, vector<48x48xf32>, vector<16x48xf32> -> vector<16x48xf32>
    %41 = arith.addf %36, %40 : vector<16x48xf32>
    %c9_42 = arith.constant 9 : index
    %c0_43 = arith.constant 0 : index
    %42 = vector.load %arg7[%c9_42, %c0_43] : memref<32x48xf32, #tpu.memory_space<vmem>>, vector<16x48xf32>
    %c2_44 = arith.constant 2 : index
    %c0_45 = arith.constant 0 : index
    %c0_46 = arith.constant 0 : index
    %43 = vector.load %arg5[%c2_44, %c0_45, %c0_46] : memref<3x48x48xf32, #tpu.memory_space<vmem>>, vector<1x48x48xf32>
    %44 = vector.shape_cast %43 : vector<1x48x48xf32> to vector<48x48xf32>
    %cst_47 = arith.constant dense<0.000000e+00> : vector<16x48xf32>
    %45 = tpu.matmul %42, %44, %cst_47 {dimension_numbers = #tpu.dot_dimension_numbers<[1], [0], [0], [1], [0, 0, 1, 1], [], []>} : vector<16x48xf32>, vector<48x48xf32>, vector<16x48xf32> -> vector<16x48xf32>
    %46 = arith.addf %41, %45 : vector<16x48xf32>
    %47 = vector.broadcast %21 : f32 to vector<16x48xf32>
    %48 = arith.mulf %47, %46 : vector<16x48xf32>
    %49 = arith.subf %31, %48 : vector<16x48xf32>
    %cst_48 = arith.constant 0.000000e+00 : f32
    %cst_49 = arith.constant 2.550000e+02 : f32
    %50 = vector.broadcast %cst_48 : f32 to vector<16x48xf32>
    %51 = arith.maximumf %50, %49 : vector<16x48xf32>
    %52 = vector.broadcast %cst_49 : f32 to vector<16x48xf32>
    %53 = arith.minimumf %52, %51 : vector<16x48xf32>
    %c2_50 = arith.constant 2 : index
    %54 = memref.load %arg1[%c2_50] : memref<20xf32, #tpu.memory_space<smem>>
    %c3 = arith.constant 3 : index
    %55 = memref.load %arg1[%c3] : memref<20xf32, #tpu.memory_space<smem>>
    %56 = arith.subf %53, %18 : vector<16x48xf32>
    %57 = vector.broadcast %54 : f32 to vector<16x48xf32>
    %58 = arith.mulf %57, %56 : vector<16x48xf32>
    %59 = arith.addf %53, %58 : vector<16x48xf32>
    %c0_51 = arith.constant 0 : index
    %c0_52 = arith.constant 0 : index
    %c0_53 = arith.constant 0 : index
    %60 = vector.load %arg3[%c0_51, %c0_52, %c0_53] : memref<1x16x48xf32, #tpu.memory_space<vmem>>, vector<1x16x48xf32>
    %61 = vector.shape_cast %60 : vector<1x16x48xf32> to vector<16x48xf32>
    %62 = arith.mulf %61, %59 : vector<16x48xf32>
    %c0_54 = arith.constant 0 : index
    %c0_55 = arith.constant 0 : index
    %c0_56 = arith.constant 0 : index
    %63 = vector.load %arg2[%c0_54, %c0_55, %c0_56] : memref<1x16x48xf32, #tpu.memory_space<vmem>>, vector<1x16x48xf32>
    %64 = vector.shape_cast %63 : vector<1x16x48xf32> to vector<16x48xf32>
    %65 = arith.addf %62, %64 : vector<16x48xf32>
    %c8_57 = arith.constant 8 : index
    %c0_58 = arith.constant 0 : index
    %66 = vector.load %arg7[%c8_57, %c0_58] : memref<32x48xf32, #tpu.memory_space<vmem>>, vector<16x48xf32>
    tpu.vector_store %arg7[%c8_57, %c0_58], %65 {strides = array<i32>} : memref<32x48xf32, #tpu.memory_space<vmem>>, vector<16x48xf32>,
    %c7_59 = arith.constant 7 : index
    %c0_60 = arith.constant 0 : index
    %67 = vector.load %arg7[%c7_59, %c0_60] : memref<32x48xf32, #tpu.memory_space<vmem>>, vector<16x48xf32>
    %c0_61 = arith.constant 0 : index
    %c0_62 = arith.constant 0 : index
    %c0_63 = arith.constant 0 : index
    %68 = vector.load %arg5[%c0_61, %c0_62, %c0_63] : memref<3x48x48xf32, #tpu.memory_space<vmem>>, vector<1x48x48xf32>
    %69 = vector.shape_cast %68 : vector<1x48x48xf32> to vector<48x48xf32>
    %cst_64 = arith.constant dense<0.000000e+00> : vector<16x48xf32>
    %70 = tpu.matmul %67, %69, %cst_64 {dimension_numbers = #tpu.dot_dimension_numbers<[1], [0], [0], [1], [0, 0, 1, 1], [], []>} : vector<16x48xf32>, vector<48x48xf32>, vector<16x48xf32> -> vector<16x48xf32>
    %c8_65 = arith.constant 8 : index
    %c0_66 = arith.constant 0 : index
    %71 = vector.load %arg7[%c8_65, %c0_66] : memref<32x48xf32, #tpu.memory_space<vmem>>, vector<16x48xf32>
    %c1_67 = arith.constant 1 : index
    %c0_68 = arith.constant 0 : index
    %c0_69 = arith.constant 0 : index
    %72 = vector.load %arg5[%c1_67, %c0_68, %c0_69] : memref<3x48x48xf32, #tpu.memory_space<vmem>>, vector<1x48x48xf32>
    %73 = vector.shape_cast %72 : vector<1x48x48xf32> to vector<48x48xf32>
    %cst_70 = arith.constant dense<0.000000e+00> : vector<16x48xf32>
    %74 = tpu.matmul %71, %73, %cst_70 {dimension_numbers = #tpu.dot_dimension_numbers<[1], [0], [0], [1], [0, 0, 1, 1], [], []>} : vector<16x48xf32>, vector<48x48xf32>, vector<16x48xf32> -> vector<16x48xf32>
    %75 = arith.addf %70, %74 : vector<16x48xf32>
    %c9_71 = arith.constant 9 : index
    %c0_72 = arith.constant 0 : index
    %76 = vector.load %arg7[%c9_71, %c0_72] : memref<32x48xf32, #tpu.memory_space<vmem>>, vector<16x48xf32>
    %c2_73 = arith.constant 2 : index
    %c0_74 = arith.constant 0 : index
    %c0_75 = arith.constant 0 : index
    %77 = vector.load %arg5[%c2_73, %c0_74, %c0_75] : memref<3x48x48xf32, #tpu.memory_space<vmem>>, vector<1x48x48xf32>
    %78 = vector.shape_cast %77 : vector<1x48x48xf32> to vector<48x48xf32>
    %cst_76 = arith.constant dense<0.000000e+00> : vector<16x48xf32>
    %79 = tpu.matmul %76, %78, %cst_76 {dimension_numbers = #tpu.dot_dimension_numbers<[1], [0], [0], [1], [0, 0, 1, 1], [], []>} : vector<16x48xf32>, vector<48x48xf32>, vector<16x48xf32> -> vector<16x48xf32>
    %80 = arith.addf %75, %79 : vector<16x48xf32>
    %81 = vector.broadcast %55 : f32 to vector<16x48xf32>
    %82 = arith.mulf %81, %80 : vector<16x48xf32>
    %83 = arith.subf %65, %82 : vector<16x48xf32>
    %cst_77 = arith.constant 0.000000e+00 : f32
    %cst_78 = arith.constant 2.550000e+02 : f32
    %84 = vector.broadcast %cst_77 : f32 to vector<16x48xf32>
    %85 = arith.maximumf %84, %83 : vector<16x48xf32>
    %86 = vector.broadcast %cst_78 : f32 to vector<16x48xf32>
    %87 = arith.minimumf %86, %85 : vector<16x48xf32>
    %c4 = arith.constant 4 : index
    %88 = memref.load %arg1[%c4] : memref<20xf32, #tpu.memory_space<smem>>
    %c5 = arith.constant 5 : index
    %89 = memref.load %arg1[%c5] : memref<20xf32, #tpu.memory_space<smem>>
    %90 = arith.subf %87, %53 : vector<16x48xf32>
    %91 = vector.broadcast %88 : f32 to vector<16x48xf32>
    %92 = arith.mulf %91, %90 : vector<16x48xf32>
    %93 = arith.addf %87, %92 : vector<16x48xf32>
    %c0_79 = arith.constant 0 : index
    %c0_80 = arith.constant 0 : index
    %c0_81 = arith.constant 0 : index
    %94 = vector.load %arg3[%c0_79, %c0_80, %c0_81] : memref<1x16x48xf32, #tpu.memory_space<vmem>>, vector<1x16x48xf32>
    %95 = vector.shape_cast %94 : vector<1x16x48xf32> to vector<16x48xf32>
    %96 = arith.mulf %95, %93 : vector<16x48xf32>
    %c0_82 = arith.constant 0 : index
    %c0_83 = arith.constant 0 : index
    %c0_84 = arith.constant 0 : index
    %97 = vector.load %arg2[%c0_82, %c0_83, %c0_84] : memref<1x16x48xf32, #tpu.memory_space<vmem>>, vector<1x16x48xf32>
    %98 = vector.shape_cast %97 : vector<1x16x48xf32> to vector<16x48xf32>
    %99 = arith.addf %96, %98 : vector<16x48xf32>
    %c8_85 = arith.constant 8 : index
    %c0_86 = arith.constant 0 : index
    %100 = vector.load %arg7[%c8_85, %c0_86] : memref<32x48xf32, #tpu.memory_space<vmem>>, vector<16x48xf32>
    tpu.vector_store %arg7[%c8_85, %c0_86], %99 {strides = array<i32>} : memref<32x48xf32, #tpu.memory_space<vmem>>, vector<16x48xf32>,
    %c7_87 = arith.constant 7 : index
    %c0_88 = arith.constant 0 : index
    %101 = vector.load %arg7[%c7_87, %c0_88] : memref<32x48xf32, #tpu.memory_space<vmem>>, vector<16x48xf32>
    %c0_89 = arith.constant 0 : index
    %c0_90 = arith.constant 0 : index
    %c0_91 = arith.constant 0 : index
    %102 = vector.load %arg5[%c0_89, %c0_90, %c0_91] : memref<3x48x48xf32, #tpu.memory_space<vmem>>, vector<1x48x48xf32>
    %103 = vector.shape_cast %102 : vector<1x48x48xf32> to vector<48x48xf32>
    %cst_92 = arith.constant dense<0.000000e+00> : vector<16x48xf32>
    %104 = tpu.matmul %101, %103, %cst_92 {dimension_numbers = #tpu.dot_dimension_numbers<[1], [0], [0], [1], [0, 0, 1, 1], [], []>} : vector<16x48xf32>, vector<48x48xf32>, vector<16x48xf32> -> vector<16x48xf32>
    %c8_93 = arith.constant 8 : index
    %c0_94 = arith.constant 0 : index
    %105 = vector.load %arg7[%c8_93, %c0_94] : memref<32x48xf32, #tpu.memory_space<vmem>>, vector<16x48xf32>
    %c1_95 = arith.constant 1 : index
    %c0_96 = arith.constant 0 : index
    %c0_97 = arith.constant 0 : index
    %106 = vector.load %arg5[%c1_95, %c0_96, %c0_97] : memref<3x48x48xf32, #tpu.memory_space<vmem>>, vector<1x48x48xf32>
    %107 = vector.shape_cast %106 : vector<1x48x48xf32> to vector<48x48xf32>
    %cst_98 = arith.constant dense<0.000000e+00> : vector<16x48xf32>
    %108 = tpu.matmul %105, %107, %cst_98 {dimension_numbers = #tpu.dot_dimension_numbers<[1], [0], [0], [1], [0, 0, 1, 1], [], []>} : vector<16x48xf32>, vector<48x48xf32>, vector<16x48xf32> -> vector<16x48xf32>
    %109 = arith.addf %104, %108 : vector<16x48xf32>
    %c9_99 = arith.constant 9 : index
    %c0_100 = arith.constant 0 : index
    %110 = vector.load %arg7[%c9_99, %c0_100] : memref<32x48xf32, #tpu.memory_space<vmem>>, vector<16x48xf32>
    %c2_101 = arith.constant 2 : index
    %c0_102 = arith.constant 0 : index
    %c0_103 = arith.constant 0 : index
    %111 = vector.load %arg5[%c2_101, %c0_102, %c0_103] : memref<3x48x48xf32, #tpu.memory_space<vmem>>, vector<1x48x48xf32>
    %112 = vector.shape_cast %111 : vector<1x48x48xf32> to vector<48x48xf32>
    %cst_104 = arith.constant dense<0.000000e+00> : vector<16x48xf32>
    %113 = tpu.matmul %110, %112, %cst_104 {dimension_numbers = #tpu.dot_dimension_numbers<[1], [0], [0], [1], [0, 0, 1, 1], [], []>} : vector<16x48xf32>, vector<48x48xf32>, vector<16x48xf32> -> vector<16x48xf32>
    %114 = arith.addf %109, %113 : vector<16x48xf32>
    %115 = vector.broadcast %89 : f32 to vector<16x48xf32>
    %116 = arith.mulf %115, %114 : vector<16x48xf32>
    %117 = arith.subf %99, %116 : vector<16x48xf32>
    %cst_105 = arith.constant 0.000000e+00 : f32
    %cst_106 = arith.constant 2.550000e+02 : f32
    %118 = vector.broadcast %cst_105 : f32 to vector<16x48xf32>
    %119 = arith.maximumf %118, %117 : vector<16x48xf32>
    %120 = vector.broadcast %cst_106 : f32 to vector<16x48xf32>
    %121 = arith.minimumf %120, %119 : vector<16x48xf32>
    %c6 = arith.constant 6 : index
    %122 = memref.load %arg1[%c6] : memref<20xf32, #tpu.memory_space<smem>>
    %c7_107 = arith.constant 7 : index
    %123 = memref.load %arg1[%c7_107] : memref<20xf32, #tpu.memory_space<smem>>
    %124 = arith.subf %121, %87 : vector<16x48xf32>
    %125 = vector.broadcast %122 : f32 to vector<16x48xf32>
    %126 = arith.mulf %125, %124 : vector<16x48xf32>
    %127 = arith.addf %121, %126 : vector<16x48xf32>
    %c0_108 = arith.constant 0 : index
    %c0_109 = arith.constant 0 : index
    %c0_110 = arith.constant 0 : index
    %128 = vector.load %arg3[%c0_108, %c0_109, %c0_110] : memref<1x16x48xf32, #tpu.memory_space<vmem>>, vector<1x16x48xf32>
    %129 = vector.shape_cast %128 : vector<1x16x48xf32> to vector<16x48xf32>
    %130 = arith.mulf %129, %127 : vector<16x48xf32>
    %c0_111 = arith.constant 0 : index
    %c0_112 = arith.constant 0 : index
    %c0_113 = arith.constant 0 : index
    %131 = vector.load %arg2[%c0_111, %c0_112, %c0_113] : memref<1x16x48xf32, #tpu.memory_space<vmem>>, vector<1x16x48xf32>
    %132 = vector.shape_cast %131 : vector<1x16x48xf32> to vector<16x48xf32>
    %133 = arith.addf %130, %132 : vector<16x48xf32>
    %c8_114 = arith.constant 8 : index
    %c0_115 = arith.constant 0 : index
    %134 = vector.load %arg7[%c8_114, %c0_115] : memref<32x48xf32, #tpu.memory_space<vmem>>, vector<16x48xf32>
    tpu.vector_store %arg7[%c8_114, %c0_115], %133 {strides = array<i32>} : memref<32x48xf32, #tpu.memory_space<vmem>>, vector<16x48xf32>,
    %c7_116 = arith.constant 7 : index
    %c0_117 = arith.constant 0 : index
    %135 = vector.load %arg7[%c7_116, %c0_117] : memref<32x48xf32, #tpu.memory_space<vmem>>, vector<16x48xf32>
    %c0_118 = arith.constant 0 : index
    %c0_119 = arith.constant 0 : index
    %c0_120 = arith.constant 0 : index
    %136 = vector.load %arg5[%c0_118, %c0_119, %c0_120] : memref<3x48x48xf32, #tpu.memory_space<vmem>>, vector<1x48x48xf32>
    %137 = vector.shape_cast %136 : vector<1x48x48xf32> to vector<48x48xf32>
    %cst_121 = arith.constant dense<0.000000e+00> : vector<16x48xf32>
    %138 = tpu.matmul %135, %137, %cst_121 {dimension_numbers = #tpu.dot_dimension_numbers<[1], [0], [0], [1], [0, 0, 1, 1], [], []>} : vector<16x48xf32>, vector<48x48xf32>, vector<16x48xf32> -> vector<16x48xf32>
    %c8_122 = arith.constant 8 : index
    %c0_123 = arith.constant 0 : index
    %139 = vector.load %arg7[%c8_122, %c0_123] : memref<32x48xf32, #tpu.memory_space<vmem>>, vector<16x48xf32>
    %c1_124 = arith.constant 1 : index
    %c0_125 = arith.constant 0 : index
    %c0_126 = arith.constant 0 : index
    %140 = vector.load %arg5[%c1_124, %c0_125, %c0_126] : memref<3x48x48xf32, #tpu.memory_space<vmem>>, vector<1x48x48xf32>
    %141 = vector.shape_cast %140 : vector<1x48x48xf32> to vector<48x48xf32>
    %cst_127 = arith.constant dense<0.000000e+00> : vector<16x48xf32>
    %142 = tpu.matmul %139, %141, %cst_127 {dimension_numbers = #tpu.dot_dimension_numbers<[1], [0], [0], [1], [0, 0, 1, 1], [], []>} : vector<16x48xf32>, vector<48x48xf32>, vector<16x48xf32> -> vector<16x48xf32>
    %143 = arith.addf %138, %142 : vector<16x48xf32>
    %c9_128 = arith.constant 9 : index
    %c0_129 = arith.constant 0 : index
    %144 = vector.load %arg7[%c9_128, %c0_129] : memref<32x48xf32, #tpu.memory_space<vmem>>, vector<16x48xf32>
    %c2_130 = arith.constant 2 : index
    %c0_131 = arith.constant 0 : index
    %c0_132 = arith.constant 0 : index
    %145 = vector.load %arg5[%c2_130, %c0_131, %c0_132] : memref<3x48x48xf32, #tpu.memory_space<vmem>>, vector<1x48x48xf32>
    %146 = vector.shape_cast %145 : vector<1x48x48xf32> to vector<48x48xf32>
    %cst_133 = arith.constant dense<0.000000e+00> : vector<16x48xf32>
    %147 = tpu.matmul %144, %146, %cst_133 {dimension_numbers = #tpu.dot_dimension_numbers<[1], [0], [0], [1], [0, 0, 1, 1], [], []>} : vector<16x48xf32>, vector<48x48xf32>, vector<16x48xf32> -> vector<16x48xf32>
    %148 = arith.addf %143, %147 : vector<16x48xf32>
    %149 = vector.broadcast %123 : f32 to vector<16x48xf32>
    %150 = arith.mulf %149, %148 : vector<16x48xf32>
    %151 = arith.subf %133, %150 : vector<16x48xf32>
    %cst_134 = arith.constant 0.000000e+00 : f32
    %cst_135 = arith.constant 2.550000e+02 : f32
    %152 = vector.broadcast %cst_134 : f32 to vector<16x48xf32>
    %153 = arith.maximumf %152, %151 : vector<16x48xf32>
    %154 = vector.broadcast %cst_135 : f32 to vector<16x48xf32>
    %155 = arith.minimumf %154, %153 : vector<16x48xf32>
    %c8_136 = arith.constant 8 : index
    %156 = memref.load %arg1[%c8_136] : memref<20xf32, #tpu.memory_space<smem>>
    %c9_137 = arith.constant 9 : index
    %157 = memref.load %arg1[%c9_137] : memref<20xf32, #tpu.memory_space<smem>>
    %158 = arith.subf %155, %121 : vector<16x48xf32>
    %159 = vector.broadcast %156 : f32 to vector<16x48xf32>
    %160 = arith.mulf %159, %158 : vector<16x48xf32>
    %161 = arith.addf %155, %160 : vector<16x48xf32>
    %c0_138 = arith.constant 0 : index
    %c0_139 = arith.constant 0 : index
    %c0_140 = arith.constant 0 : index
    %162 = vector.load %arg3[%c0_138, %c0_139, %c0_140] : memref<1x16x48xf32, #tpu.memory_space<vmem>>, vector<1x16x48xf32>
    %163 = vector.shape_cast %162 : vector<1x16x48xf32> to vector<16x48xf32>
    %164 = arith.mulf %163, %161 : vector<16x48xf32>
    %c0_141 = arith.constant 0 : index
    %c0_142 = arith.constant 0 : index
    %c0_143 = arith.constant 0 : index
    %165 = vector.load %arg2[%c0_141, %c0_142, %c0_143] : memref<1x16x48xf32, #tpu.memory_space<vmem>>, vector<1x16x48xf32>
    %166 = vector.shape_cast %165 : vector<1x16x48xf32> to vector<16x48xf32>
    %167 = arith.addf %164, %166 : vector<16x48xf32>
    %c8_144 = arith.constant 8 : index
    %c0_145 = arith.constant 0 : index
    %168 = vector.load %arg7[%c8_144, %c0_145] : memref<32x48xf32, #tpu.memory_space<vmem>>, vector<16x48xf32>
    tpu.vector_store %arg7[%c8_144, %c0_145], %167 {strides = array<i32>} : memref<32x48xf32, #tpu.memory_space<vmem>>, vector<16x48xf32>,
    %c7_146 = arith.constant 7 : index
    %c0_147 = arith.constant 0 : index
    %169 = vector.load %arg7[%c7_146, %c0_147] : memref<32x48xf32, #tpu.memory_space<vmem>>, vector<16x48xf32>
    %c0_148 = arith.constant 0 : index
    %c0_149 = arith.constant 0 : index
    %c0_150 = arith.constant 0 : index
    %170 = vector.load %arg5[%c0_148, %c0_149, %c0_150] : memref<3x48x48xf32, #tpu.memory_space<vmem>>, vector<1x48x48xf32>
    %171 = vector.shape_cast %170 : vector<1x48x48xf32> to vector<48x48xf32>
    %cst_151 = arith.constant dense<0.000000e+00> : vector<16x48xf32>
    %172 = tpu.matmul %169, %171, %cst_151 {dimension_numbers = #tpu.dot_dimension_numbers<[1], [0], [0], [1], [0, 0, 1, 1], [], []>} : vector<16x48xf32>, vector<48x48xf32>, vector<16x48xf32> -> vector<16x48xf32>
    %c8_152 = arith.constant 8 : index
    %c0_153 = arith.constant 0 : index
    %173 = vector.load %arg7[%c8_152, %c0_153] : memref<32x48xf32, #tpu.memory_space<vmem>>, vector<16x48xf32>
    %c1_154 = arith.constant 1 : index
    %c0_155 = arith.constant 0 : index
    %c0_156 = arith.constant 0 : index
    %174 = vector.load %arg5[%c1_154, %c0_155, %c0_156] : memref<3x48x48xf32, #tpu.memory_space<vmem>>, vector<1x48x48xf32>
    %175 = vector.shape_cast %174 : vector<1x48x48xf32> to vector<48x48xf32>
    %cst_157 = arith.constant dense<0.000000e+00> : vector<16x48xf32>
    %176 = tpu.matmul %173, %175, %cst_157 {dimension_numbers = #tpu.dot_dimension_numbers<[1], [0], [0], [1], [0, 0, 1, 1], [], []>} : vector<16x48xf32>, vector<48x48xf32>, vector<16x48xf32> -> vector<16x48xf32>
    %177 = arith.addf %172, %176 : vector<16x48xf32>
    %c9_158 = arith.constant 9 : index
    %c0_159 = arith.constant 0 : index
    %178 = vector.load %arg7[%c9_158, %c0_159] : memref<32x48xf32, #tpu.memory_space<vmem>>, vector<16x48xf32>
    %c2_160 = arith.constant 2 : index
    %c0_161 = arith.constant 0 : index
    %c0_162 = arith.constant 0 : index
    %179 = vector.load %arg5[%c2_160, %c0_161, %c0_162] : memref<3x48x48xf32, #tpu.memory_space<vmem>>, vector<1x48x48xf32>
    %180 = vector.shape_cast %179 : vector<1x48x48xf32> to vector<48x48xf32>
    %cst_163 = arith.constant dense<0.000000e+00> : vector<16x48xf32>
    %181 = tpu.matmul %178, %180, %cst_163 {dimension_numbers = #tpu.dot_dimension_numbers<[1], [0], [0], [1], [0, 0, 1, 1], [], []>} : vector<16x48xf32>, vector<48x48xf32>, vector<16x48xf32> -> vector<16x48xf32>
    %182 = arith.addf %177, %181 : vector<16x48xf32>
    %183 = vector.broadcast %157 : f32 to vector<16x48xf32>
    %184 = arith.mulf %183, %182 : vector<16x48xf32>
    %185 = arith.subf %167, %184 : vector<16x48xf32>
    %cst_164 = arith.constant 0.000000e+00 : f32
    %cst_165 = arith.constant 2.550000e+02 : f32
    %186 = vector.broadcast %cst_164 : f32 to vector<16x48xf32>
    %187 = arith.maximumf %186, %185 : vector<16x48xf32>
    %188 = vector.broadcast %cst_165 : f32 to vector<16x48xf32>
    %189 = arith.minimumf %188, %187 : vector<16x48xf32>
    %c10 = arith.constant 10 : index
    %190 = memref.load %arg1[%c10] : memref<20xf32, #tpu.memory_space<smem>>
    %c11 = arith.constant 11 : index
    %191 = memref.load %arg1[%c11] : memref<20xf32, #tpu.memory_space<smem>>
    %192 = arith.subf %189, %155 : vector<16x48xf32>
    %193 = vector.broadcast %190 : f32 to vector<16x48xf32>
    %194 = arith.mulf %193, %192 : vector<16x48xf32>
    %195 = arith.addf %189, %194 : vector<16x48xf32>
    %c0_166 = arith.constant 0 : index
    %c0_167 = arith.constant 0 : index
    %c0_168 = arith.constant 0 : index
    %196 = vector.load %arg3[%c0_166, %c0_167, %c0_168] : memref<1x16x48xf32, #tpu.memory_space<vmem>>, vector<1x16x48xf32>
    %197 = vector.shape_cast %196 : vector<1x16x48xf32> to vector<16x48xf32>
    %198 = arith.mulf %197, %195 : vector<16x48xf32>
    %c0_169 = arith.constant 0 : index
    %c0_170 = arith.constant 0 : index
    %c0_171 = arith.constant 0 : index
    %199 = vector.load %arg2[%c0_169, %c0_170, %c0_171] : memref<1x16x48xf32, #tpu.memory_space<vmem>>, vector<1x16x48xf32>
    %200 = vector.shape_cast %199 : vector<1x16x48xf32> to vector<16x48xf32>
    %201 = arith.addf %198, %200 : vector<16x48xf32>
    %c8_172 = arith.constant 8 : index
    %c0_173 = arith.constant 0 : index
    %202 = vector.load %arg7[%c8_172, %c0_173] : memref<32x48xf32, #tpu.memory_space<vmem>>, vector<16x48xf32>
    tpu.vector_store %arg7[%c8_172, %c0_173], %201 {strides = array<i32>} : memref<32x48xf32, #tpu.memory_space<vmem>>, vector<16x48xf32>,
    %c7_174 = arith.constant 7 : index
    %c0_175 = arith.constant 0 : index
    %203 = vector.load %arg7[%c7_174, %c0_175] : memref<32x48xf32, #tpu.memory_space<vmem>>, vector<16x48xf32>
    %c0_176 = arith.constant 0 : index
    %c0_177 = arith.constant 0 : index
    %c0_178 = arith.constant 0 : index
    %204 = vector.load %arg5[%c0_176, %c0_177, %c0_178] : memref<3x48x48xf32, #tpu.memory_space<vmem>>, vector<1x48x48xf32>
    %205 = vector.shape_cast %204 : vector<1x48x48xf32> to vector<48x48xf32>
    %cst_179 = arith.constant dense<0.000000e+00> : vector<16x48xf32>
    %206 = tpu.matmul %203, %205, %cst_179 {dimension_numbers = #tpu.dot_dimension_numbers<[1], [0], [0], [1], [0, 0, 1, 1], [], []>} : vector<16x48xf32>, vector<48x48xf32>, vector<16x48xf32> -> vector<16x48xf32>
    %c8_180 = arith.constant 8 : index
    %c0_181 = arith.constant 0 : index
    %207 = vector.load %arg7[%c8_180, %c0_181] : memref<32x48xf32, #tpu.memory_space<vmem>>, vector<16x48xf32>
    %c1_182 = arith.constant 1 : index
    %c0_183 = arith.constant 0 : index
    %c0_184 = arith.constant 0 : index
    %208 = vector.load %arg5[%c1_182, %c0_183, %c0_184] : memref<3x48x48xf32, #tpu.memory_space<vmem>>, vector<1x48x48xf32>
    %209 = vector.shape_cast %208 : vector<1x48x48xf32> to vector<48x48xf32>
    %cst_185 = arith.constant dense<0.000000e+00> : vector<16x48xf32>
    %210 = tpu.matmul %207, %209, %cst_185 {dimension_numbers = #tpu.dot_dimension_numbers<[1], [0], [0], [1], [0, 0, 1, 1], [], []>} : vector<16x48xf32>, vector<48x48xf32>, vector<16x48xf32> -> vector<16x48xf32>
    %211 = arith.addf %206, %210 : vector<16x48xf32>
    %c9_186 = arith.constant 9 : index
    %c0_187 = arith.constant 0 : index
    %212 = vector.load %arg7[%c9_186, %c0_187] : memref<32x48xf32, #tpu.memory_space<vmem>>, vector<16x48xf32>
    %c2_188 = arith.constant 2 : index
    %c0_189 = arith.constant 0 : index
    %c0_190 = arith.constant 0 : index
    %213 = vector.load %arg5[%c2_188, %c0_189, %c0_190] : memref<3x48x48xf32, #tpu.memory_space<vmem>>, vector<1x48x48xf32>
    %214 = vector.shape_cast %213 : vector<1x48x48xf32> to vector<48x48xf32>
    %cst_191 = arith.constant dense<0.000000e+00> : vector<16x48xf32>
    %215 = tpu.matmul %212, %214, %cst_191 {dimension_numbers = #tpu.dot_dimension_numbers<[1], [0], [0], [1], [0, 0, 1, 1], [], []>} : vector<16x48xf32>, vector<48x48xf32>, vector<16x48xf32> -> vector<16x48xf32>
    %216 = arith.addf %211, %215 : vector<16x48xf32>
    %217 = vector.broadcast %191 : f32 to vector<16x48xf32>
    %218 = arith.mulf %217, %216 : vector<16x48xf32>
    %219 = arith.subf %201, %218 : vector<16x48xf32>
    %cst_192 = arith.constant 0.000000e+00 : f32
    %cst_193 = arith.constant 2.550000e+02 : f32
    %220 = vector.broadcast %cst_192 : f32 to vector<16x48xf32>
    %221 = arith.maximumf %220, %219 : vector<16x48xf32>
    %222 = vector.broadcast %cst_193 : f32 to vector<16x48xf32>
    %223 = arith.minimumf %222, %221 : vector<16x48xf32>
    %c12 = arith.constant 12 : index
    %224 = memref.load %arg1[%c12] : memref<20xf32, #tpu.memory_space<smem>>
    %c13 = arith.constant 13 : index
    %225 = memref.load %arg1[%c13] : memref<20xf32, #tpu.memory_space<smem>>
    %226 = arith.subf %223, %189 : vector<16x48xf32>
    %227 = vector.broadcast %224 : f32 to vector<16x48xf32>
    %228 = arith.mulf %227, %226 : vector<16x48xf32>
    %229 = arith.addf %223, %228 : vector<16x48xf32>
    %c0_194 = arith.constant 0 : index
    %c0_195 = arith.constant 0 : index
    %c0_196 = arith.constant 0 : index
    %230 = vector.load %arg3[%c0_194, %c0_195, %c0_196] : memref<1x16x48xf32, #tpu.memory_space<vmem>>, vector<1x16x48xf32>
    %231 = vector.shape_cast %230 : vector<1x16x48xf32> to vector<16x48xf32>
    %232 = arith.mulf %231, %229 : vector<16x48xf32>
    %c0_197 = arith.constant 0 : index
    %c0_198 = arith.constant 0 : index
    %c0_199 = arith.constant 0 : index
    %233 = vector.load %arg2[%c0_197, %c0_198, %c0_199] : memref<1x16x48xf32, #tpu.memory_space<vmem>>, vector<1x16x48xf32>
    %234 = vector.shape_cast %233 : vector<1x16x48xf32> to vector<16x48xf32>
    %235 = arith.addf %232, %234 : vector<16x48xf32>
    %c8_200 = arith.constant 8 : index
    %c0_201 = arith.constant 0 : index
    %236 = vector.load %arg7[%c8_200, %c0_201] : memref<32x48xf32, #tpu.memory_space<vmem>>, vector<16x48xf32>
    tpu.vector_store %arg7[%c8_200, %c0_201], %235 {strides = array<i32>} : memref<32x48xf32, #tpu.memory_space<vmem>>, vector<16x48xf32>,
    %c7_202 = arith.constant 7 : index
    %c0_203 = arith.constant 0 : index
    %237 = vector.load %arg7[%c7_202, %c0_203] : memref<32x48xf32, #tpu.memory_space<vmem>>, vector<16x48xf32>
    %c0_204 = arith.constant 0 : index
    %c0_205 = arith.constant 0 : index
    %c0_206 = arith.constant 0 : index
    %238 = vector.load %arg5[%c0_204, %c0_205, %c0_206] : memref<3x48x48xf32, #tpu.memory_space<vmem>>, vector<1x48x48xf32>
    %239 = vector.shape_cast %238 : vector<1x48x48xf32> to vector<48x48xf32>
    %cst_207 = arith.constant dense<0.000000e+00> : vector<16x48xf32>
    %240 = tpu.matmul %237, %239, %cst_207 {dimension_numbers = #tpu.dot_dimension_numbers<[1], [0], [0], [1], [0, 0, 1, 1], [], []>} : vector<16x48xf32>, vector<48x48xf32>, vector<16x48xf32> -> vector<16x48xf32>
    %c8_208 = arith.constant 8 : index
    %c0_209 = arith.constant 0 : index
    %241 = vector.load %arg7[%c8_208, %c0_209] : memref<32x48xf32, #tpu.memory_space<vmem>>, vector<16x48xf32>
    %c1_210 = arith.constant 1 : index
    %c0_211 = arith.constant 0 : index
    %c0_212 = arith.constant 0 : index
    %242 = vector.load %arg5[%c1_210, %c0_211, %c0_212] : memref<3x48x48xf32, #tpu.memory_space<vmem>>, vector<1x48x48xf32>
    %243 = vector.shape_cast %242 : vector<1x48x48xf32> to vector<48x48xf32>
    %cst_213 = arith.constant dense<0.000000e+00> : vector<16x48xf32>
    %244 = tpu.matmul %241, %243, %cst_213 {dimension_numbers = #tpu.dot_dimension_numbers<[1], [0], [0], [1], [0, 0, 1, 1], [], []>} : vector<16x48xf32>, vector<48x48xf32>, vector<16x48xf32> -> vector<16x48xf32>
    %245 = arith.addf %240, %244 : vector<16x48xf32>
    %c9_214 = arith.constant 9 : index
    %c0_215 = arith.constant 0 : index
    %246 = vector.load %arg7[%c9_214, %c0_215] : memref<32x48xf32, #tpu.memory_space<vmem>>, vector<16x48xf32>
    %c2_216 = arith.constant 2 : index
    %c0_217 = arith.constant 0 : index
    %c0_218 = arith.constant 0 : index
    %247 = vector.load %arg5[%c2_216, %c0_217, %c0_218] : memref<3x48x48xf32, #tpu.memory_space<vmem>>, vector<1x48x48xf32>
    %248 = vector.shape_cast %247 : vector<1x48x48xf32> to vector<48x48xf32>
    %cst_219 = arith.constant dense<0.000000e+00> : vector<16x48xf32>
    %249 = tpu.matmul %246, %248, %cst_219 {dimension_numbers = #tpu.dot_dimension_numbers<[1], [0], [0], [1], [0, 0, 1, 1], [], []>} : vector<16x48xf32>, vector<48x48xf32>, vector<16x48xf32> -> vector<16x48xf32>
    %250 = arith.addf %245, %249 : vector<16x48xf32>
    %251 = vector.broadcast %225 : f32 to vector<16x48xf32>
    %252 = arith.mulf %251, %250 : vector<16x48xf32>
    %253 = arith.subf %235, %252 : vector<16x48xf32>
    %cst_220 = arith.constant 0.000000e+00 : f32
    %cst_221 = arith.constant 2.550000e+02 : f32
    %254 = vector.broadcast %cst_220 : f32 to vector<16x48xf32>
    %255 = arith.maximumf %254, %253 : vector<16x48xf32>
    %256 = vector.broadcast %cst_221 : f32 to vector<16x48xf32>
    %257 = arith.minimumf %256, %255 : vector<16x48xf32>
    %c14 = arith.constant 14 : index
    %258 = memref.load %arg1[%c14] : memref<20xf32, #tpu.memory_space<smem>>
    %c15 = arith.constant 15 : index
    %259 = memref.load %arg1[%c15] : memref<20xf32, #tpu.memory_space<smem>>
    %260 = arith.subf %257, %223 : vector<16x48xf32>
    %261 = vector.broadcast %258 : f32 to vector<16x48xf32>
    %262 = arith.mulf %261, %260 : vector<16x48xf32>
    %263 = arith.addf %257, %262 : vector<16x48xf32>
    %c0_222 = arith.constant 0 : index
    %c0_223 = arith.constant 0 : index
    %c0_224 = arith.constant 0 : index
    %264 = vector.load %arg3[%c0_222, %c0_223, %c0_224] : memref<1x16x48xf32, #tpu.memory_space<vmem>>, vector<1x16x48xf32>
    %265 = vector.shape_cast %264 : vector<1x16x48xf32> to vector<16x48xf32>
    %266 = arith.mulf %265, %263 : vector<16x48xf32>
    %c0_225 = arith.constant 0 : index
    %c0_226 = arith.constant 0 : index
    %c0_227 = arith.constant 0 : index
    %267 = vector.load %arg2[%c0_225, %c0_226, %c0_227] : memref<1x16x48xf32, #tpu.memory_space<vmem>>, vector<1x16x48xf32>
    %268 = vector.shape_cast %267 : vector<1x16x48xf32> to vector<16x48xf32>
    %269 = arith.addf %266, %268 : vector<16x48xf32>
    %c8_228 = arith.constant 8 : index
    %c0_229 = arith.constant 0 : index
    %270 = vector.load %arg7[%c8_228, %c0_229] : memref<32x48xf32, #tpu.memory_space<vmem>>, vector<16x48xf32>
    tpu.vector_store %arg7[%c8_228, %c0_229], %269 {strides = array<i32>} : memref<32x48xf32, #tpu.memory_space<vmem>>, vector<16x48xf32>,
    %c7_230 = arith.constant 7 : index
    %c0_231 = arith.constant 0 : index
    %271 = vector.load %arg7[%c7_230, %c0_231] : memref<32x48xf32, #tpu.memory_space<vmem>>, vector<16x48xf32>
    %c0_232 = arith.constant 0 : index
    %c0_233 = arith.constant 0 : index
    %c0_234 = arith.constant 0 : index
    %272 = vector.load %arg5[%c0_232, %c0_233, %c0_234] : memref<3x48x48xf32, #tpu.memory_space<vmem>>, vector<1x48x48xf32>
    %273 = vector.shape_cast %272 : vector<1x48x48xf32> to vector<48x48xf32>
    %cst_235 = arith.constant dense<0.000000e+00> : vector<16x48xf32>
    %274 = tpu.matmul %271, %273, %cst_235 {dimension_numbers = #tpu.dot_dimension_numbers<[1], [0], [0], [1], [0, 0, 1, 1], [], []>} : vector<16x48xf32>, vector<48x48xf32>, vector<16x48xf32> -> vector<16x48xf32>
    %c8_236 = arith.constant 8 : index
    %c0_237 = arith.constant 0 : index
    %275 = vector.load %arg7[%c8_236, %c0_237] : memref<32x48xf32, #tpu.memory_space<vmem>>, vector<16x48xf32>
    %c1_238 = arith.constant 1 : index
    %c0_239 = arith.constant 0 : index
    %c0_240 = arith.constant 0 : index
    %276 = vector.load %arg5[%c1_238, %c0_239, %c0_240] : memref<3x48x48xf32, #tpu.memory_space<vmem>>, vector<1x48x48xf32>
    %277 = vector.shape_cast %276 : vector<1x48x48xf32> to vector<48x48xf32>
    %cst_241 = arith.constant dense<0.000000e+00> : vector<16x48xf32>
    %278 = tpu.matmul %275, %277, %cst_241 {dimension_numbers = #tpu.dot_dimension_numbers<[1], [0], [0], [1], [0, 0, 1, 1], [], []>} : vector<16x48xf32>, vector<48x48xf32>, vector<16x48xf32> -> vector<16x48xf32>
    %279 = arith.addf %274, %278 : vector<16x48xf32>
    %c9_242 = arith.constant 9 : index
    %c0_243 = arith.constant 0 : index
    %280 = vector.load %arg7[%c9_242, %c0_243] : memref<32x48xf32, #tpu.memory_space<vmem>>, vector<16x48xf32>
    %c2_244 = arith.constant 2 : index
    %c0_245 = arith.constant 0 : index
    %c0_246 = arith.constant 0 : index
    %281 = vector.load %arg5[%c2_244, %c0_245, %c0_246] : memref<3x48x48xf32, #tpu.memory_space<vmem>>, vector<1x48x48xf32>
    %282 = vector.shape_cast %281 : vector<1x48x48xf32> to vector<48x48xf32>
    %cst_247 = arith.constant dense<0.000000e+00> : vector<16x48xf32>
    %283 = tpu.matmul %280, %282, %cst_247 {dimension_numbers = #tpu.dot_dimension_numbers<[1], [0], [0], [1], [0, 0, 1, 1], [], []>} : vector<16x48xf32>, vector<48x48xf32>, vector<16x48xf32> -> vector<16x48xf32>
    %284 = arith.addf %279, %283 : vector<16x48xf32>
    %285 = vector.broadcast %259 : f32 to vector<16x48xf32>
    %286 = arith.mulf %285, %284 : vector<16x48xf32>
    %287 = arith.subf %269, %286 : vector<16x48xf32>
    %cst_248 = arith.constant 0.000000e+00 : f32
    %cst_249 = arith.constant 2.550000e+02 : f32
    %288 = vector.broadcast %cst_248 : f32 to vector<16x48xf32>
    %289 = arith.maximumf %288, %287 : vector<16x48xf32>
    %290 = vector.broadcast %cst_249 : f32 to vector<16x48xf32>
    %291 = arith.minimumf %290, %289 : vector<16x48xf32>
    %c16 = arith.constant 16 : index
    %292 = memref.load %arg1[%c16] : memref<20xf32, #tpu.memory_space<smem>>
    %c17 = arith.constant 17 : index
    %293 = memref.load %arg1[%c17] : memref<20xf32, #tpu.memory_space<smem>>
    %294 = arith.subf %291, %257 : vector<16x48xf32>
    %295 = vector.broadcast %292 : f32 to vector<16x48xf32>
    %296 = arith.mulf %295, %294 : vector<16x48xf32>
    %297 = arith.addf %291, %296 : vector<16x48xf32>
    %c0_250 = arith.constant 0 : index
    %c0_251 = arith.constant 0 : index
    %c0_252 = arith.constant 0 : index
    %298 = vector.load %arg3[%c0_250, %c0_251, %c0_252] : memref<1x16x48xf32, #tpu.memory_space<vmem>>, vector<1x16x48xf32>
    %299 = vector.shape_cast %298 : vector<1x16x48xf32> to vector<16x48xf32>
    %300 = arith.mulf %299, %297 : vector<16x48xf32>
    %c0_253 = arith.constant 0 : index
    %c0_254 = arith.constant 0 : index
    %c0_255 = arith.constant 0 : index
    %301 = vector.load %arg2[%c0_253, %c0_254, %c0_255] : memref<1x16x48xf32, #tpu.memory_space<vmem>>, vector<1x16x48xf32>
    %302 = vector.shape_cast %301 : vector<1x16x48xf32> to vector<16x48xf32>
    %303 = arith.addf %300, %302 : vector<16x48xf32>
    %c8_256 = arith.constant 8 : index
    %c0_257 = arith.constant 0 : index
    %304 = vector.load %arg7[%c8_256, %c0_257] : memref<32x48xf32, #tpu.memory_space<vmem>>, vector<16x48xf32>
    tpu.vector_store %arg7[%c8_256, %c0_257], %303 {strides = array<i32>} : memref<32x48xf32, #tpu.memory_space<vmem>>, vector<16x48xf32>,
    %c7_258 = arith.constant 7 : index
    %c0_259 = arith.constant 0 : index
    %305 = vector.load %arg7[%c7_258, %c0_259] : memref<32x48xf32, #tpu.memory_space<vmem>>, vector<16x48xf32>
    %c0_260 = arith.constant 0 : index
    %c0_261 = arith.constant 0 : index
    %c0_262 = arith.constant 0 : index
    %306 = vector.load %arg5[%c0_260, %c0_261, %c0_262] : memref<3x48x48xf32, #tpu.memory_space<vmem>>, vector<1x48x48xf32>
    %307 = vector.shape_cast %306 : vector<1x48x48xf32> to vector<48x48xf32>
    %cst_263 = arith.constant dense<0.000000e+00> : vector<16x48xf32>
    %308 = tpu.matmul %305, %307, %cst_263 {dimension_numbers = #tpu.dot_dimension_numbers<[1], [0], [0], [1], [0, 0, 1, 1], [], []>} : vector<16x48xf32>, vector<48x48xf32>, vector<16x48xf32> -> vector<16x48xf32>
    %c8_264 = arith.constant 8 : index
    %c0_265 = arith.constant 0 : index
    %309 = vector.load %arg7[%c8_264, %c0_265] : memref<32x48xf32, #tpu.memory_space<vmem>>, vector<16x48xf32>
    %c1_266 = arith.constant 1 : index
    %c0_267 = arith.constant 0 : index
    %c0_268 = arith.constant 0 : index
    %310 = vector.load %arg5[%c1_266, %c0_267, %c0_268] : memref<3x48x48xf32, #tpu.memory_space<vmem>>, vector<1x48x48xf32>
    %311 = vector.shape_cast %310 : vector<1x48x48xf32> to vector<48x48xf32>
    %cst_269 = arith.constant dense<0.000000e+00> : vector<16x48xf32>
    %312 = tpu.matmul %309, %311, %cst_269 {dimension_numbers = #tpu.dot_dimension_numbers<[1], [0], [0], [1], [0, 0, 1, 1], [], []>} : vector<16x48xf32>, vector<48x48xf32>, vector<16x48xf32> -> vector<16x48xf32>
    %313 = arith.addf %308, %312 : vector<16x48xf32>
    %c9_270 = arith.constant 9 : index
    %c0_271 = arith.constant 0 : index
    %314 = vector.load %arg7[%c9_270, %c0_271] : memref<32x48xf32, #tpu.memory_space<vmem>>, vector<16x48xf32>
    %c2_272 = arith.constant 2 : index
    %c0_273 = arith.constant 0 : index
    %c0_274 = arith.constant 0 : index
    %315 = vector.load %arg5[%c2_272, %c0_273, %c0_274] : memref<3x48x48xf32, #tpu.memory_space<vmem>>, vector<1x48x48xf32>
    %316 = vector.shape_cast %315 : vector<1x48x48xf32> to vector<48x48xf32>
    %cst_275 = arith.constant dense<0.000000e+00> : vector<16x48xf32>
    %317 = tpu.matmul %314, %316, %cst_275 {dimension_numbers = #tpu.dot_dimension_numbers<[1], [0], [0], [1], [0, 0, 1, 1], [], []>} : vector<16x48xf32>, vector<48x48xf32>, vector<16x48xf32> -> vector<16x48xf32>
    %318 = arith.addf %313, %317 : vector<16x48xf32>
    %319 = vector.broadcast %293 : f32 to vector<16x48xf32>
    %320 = arith.mulf %319, %318 : vector<16x48xf32>
    %321 = arith.subf %303, %320 : vector<16x48xf32>
    %cst_276 = arith.constant 0.000000e+00 : f32
    %cst_277 = arith.constant 2.550000e+02 : f32
    %322 = vector.broadcast %cst_276 : f32 to vector<16x48xf32>
    %323 = arith.maximumf %322, %321 : vector<16x48xf32>
    %324 = vector.broadcast %cst_277 : f32 to vector<16x48xf32>
    %325 = arith.minimumf %324, %323 : vector<16x48xf32>
    %c18 = arith.constant 18 : index
    %326 = memref.load %arg1[%c18] : memref<20xf32, #tpu.memory_space<smem>>
    %c19 = arith.constant 19 : index
    %327 = memref.load %arg1[%c19] : memref<20xf32, #tpu.memory_space<smem>>
    %328 = arith.subf %325, %291 : vector<16x48xf32>
    %329 = vector.broadcast %326 : f32 to vector<16x48xf32>
    %330 = arith.mulf %329, %328 : vector<16x48xf32>
    %331 = arith.addf %325, %330 : vector<16x48xf32>
    %c0_278 = arith.constant 0 : index
    %c0_279 = arith.constant 0 : index
    %c0_280 = arith.constant 0 : index
    %332 = vector.load %arg3[%c0_278, %c0_279, %c0_280] : memref<1x16x48xf32, #tpu.memory_space<vmem>>, vector<1x16x48xf32>
    %333 = vector.shape_cast %332 : vector<1x16x48xf32> to vector<16x48xf32>
    %334 = arith.mulf %333, %331 : vector<16x48xf32>
    %c0_281 = arith.constant 0 : index
    %c0_282 = arith.constant 0 : index
    %c0_283 = arith.constant 0 : index
    %335 = vector.load %arg2[%c0_281, %c0_282, %c0_283] : memref<1x16x48xf32, #tpu.memory_space<vmem>>, vector<1x16x48xf32>
    %336 = vector.shape_cast %335 : vector<1x16x48xf32> to vector<16x48xf32>
    %337 = arith.addf %334, %336 : vector<16x48xf32>
    %c8_284 = arith.constant 8 : index
    %c0_285 = arith.constant 0 : index
    %338 = vector.load %arg7[%c8_284, %c0_285] : memref<32x48xf32, #tpu.memory_space<vmem>>, vector<16x48xf32>
    tpu.vector_store %arg7[%c8_284, %c0_285], %337 {strides = array<i32>} : memref<32x48xf32, #tpu.memory_space<vmem>>, vector<16x48xf32>,
    %c7_286 = arith.constant 7 : index
    %c0_287 = arith.constant 0 : index
    %339 = vector.load %arg7[%c7_286, %c0_287] : memref<32x48xf32, #tpu.memory_space<vmem>>, vector<16x48xf32>
    %c0_288 = arith.constant 0 : index
    %c0_289 = arith.constant 0 : index
    %c0_290 = arith.constant 0 : index
    %340 = vector.load %arg5[%c0_288, %c0_289, %c0_290] : memref<3x48x48xf32, #tpu.memory_space<vmem>>, vector<1x48x48xf32>
    %341 = vector.shape_cast %340 : vector<1x48x48xf32> to vector<48x48xf32>
    %cst_291 = arith.constant dense<0.000000e+00> : vector<16x48xf32>
    %342 = tpu.matmul %339, %341, %cst_291 {dimension_numbers = #tpu.dot_dimension_numbers<[1], [0], [0], [1], [0, 0, 1, 1], [], []>} : vector<16x48xf32>, vector<48x48xf32>, vector<16x48xf32> -> vector<16x48xf32>
    %c8_292 = arith.constant 8 : index
    %c0_293 = arith.constant 0 : index
    %343 = vector.load %arg7[%c8_292, %c0_293] : memref<32x48xf32, #tpu.memory_space<vmem>>, vector<16x48xf32>
    %c1_294 = arith.constant 1 : index
    %c0_295 = arith.constant 0 : index
    %c0_296 = arith.constant 0 : index
    %344 = vector.load %arg5[%c1_294, %c0_295, %c0_296] : memref<3x48x48xf32, #tpu.memory_space<vmem>>, vector<1x48x48xf32>
    %345 = vector.shape_cast %344 : vector<1x48x48xf32> to vector<48x48xf32>
    %cst_297 = arith.constant dense<0.000000e+00> : vector<16x48xf32>
    %346 = tpu.matmul %343, %345, %cst_297 {dimension_numbers = #tpu.dot_dimension_numbers<[1], [0], [0], [1], [0, 0, 1, 1], [], []>} : vector<16x48xf32>, vector<48x48xf32>, vector<16x48xf32> -> vector<16x48xf32>
    %347 = arith.addf %342, %346 : vector<16x48xf32>
    %c9_298 = arith.constant 9 : index
    %c0_299 = arith.constant 0 : index
    %348 = vector.load %arg7[%c9_298, %c0_299] : memref<32x48xf32, #tpu.memory_space<vmem>>, vector<16x48xf32>
    %c2_300 = arith.constant 2 : index
    %c0_301 = arith.constant 0 : index
    %c0_302 = arith.constant 0 : index
    %349 = vector.load %arg5[%c2_300, %c0_301, %c0_302] : memref<3x48x48xf32, #tpu.memory_space<vmem>>, vector<1x48x48xf32>
    %350 = vector.shape_cast %349 : vector<1x48x48xf32> to vector<48x48xf32>
    %cst_303 = arith.constant dense<0.000000e+00> : vector<16x48xf32>
    %351 = tpu.matmul %348, %350, %cst_303 {dimension_numbers = #tpu.dot_dimension_numbers<[1], [0], [0], [1], [0, 0, 1, 1], [], []>} : vector<16x48xf32>, vector<48x48xf32>, vector<16x48xf32> -> vector<16x48xf32>
    %352 = arith.addf %347, %351 : vector<16x48xf32>
    %353 = vector.broadcast %327 : f32 to vector<16x48xf32>
    %354 = arith.mulf %353, %352 : vector<16x48xf32>
    %355 = arith.subf %337, %354 : vector<16x48xf32>
    %cst_304 = arith.constant 0.000000e+00 : f32
    %cst_305 = arith.constant 2.550000e+02 : f32
    %356 = vector.broadcast %cst_304 : f32 to vector<16x48xf32>
    %357 = arith.maximumf %356, %355 : vector<16x48xf32>
    %358 = vector.broadcast %cst_305 : f32 to vector<16x48xf32>
    %359 = arith.minimumf %358, %357 : vector<16x48xf32>
    %c0_306 = arith.constant 0 : index
    %c0_307 = arith.constant 0 : index
    %c0_308 = arith.constant 0 : index
    %360 = vector.load %arg6[%c0_306, %c0_307, %c0_308] : memref<1x16x48xf32, #tpu.memory_space<vmem>>, vector<1x16x48xf32>
    %361 = vector.shape_cast %360 : vector<1x16x48xf32> to vector<16x48xf32>
    %362 = vector.shape_cast %359 : vector<16x48xf32> to vector<1x16x48xf32>
    tpu.vector_store %arg6[%c0_306, %c0_307, %c0_308], %362 {strides = array<i32>} : memref<1x16x48xf32, #tpu.memory_space<vmem>>, vector<1x16x48xf32>,
    return
  }
  func.func @transform_0(%arg0: i32) -> i32 {
    %c0_i32 = arith.constant 0 : i32
    %c0_i32_0 = arith.constant 0 : i32
    return %c0_i32 : i32
  }
  func.func @transform_1(%arg0: i32) -> (i32, i32, i32) {
    %c0_i32 = arith.constant 0 : i32
    %c0_i32_0 = arith.constant 0 : i32
    %c0_i32_1 = arith.constant 0 : i32
    return %arg0, %c0_i32, %c0_i32_0 : i32, i32, i32
  }
  func.func @transform_2(%arg0: i32) -> (i32, i32, i32) {
    %c0_i32 = arith.constant 0 : i32
    %c0_i32_0 = arith.constant 0 : i32
    %c0_i32_1 = arith.constant 0 : i32
    return %arg0, %c0_i32, %c0_i32_0 : i32, i32, i32
  }
  func.func @transform_3(%arg0: i32) -> (i32, i32, i32) {
    %c0_i32 = arith.constant 0 : i32
    %c0_i32_0 = arith.constant 0 : i32
    %c0_i32_1 = arith.constant 0 : i32
    %c0_i32_2 = arith.constant 0 : i32
    return %c0_i32, %c0_i32_0, %c0_i32_1 : i32, i32, i32
  }
  func.func @transform_4(%arg0: i32) -> (i32, i32, i32) {
    %c0_i32 = arith.constant 0 : i32
    %c0_i32_0 = arith.constant 0 : i32
    %c0_i32_1 = arith.constant 0 : i32
    %c0_i32_2 = arith.constant 0 : i32
    return %c0_i32, %c0_i32_0, %c0_i32_1 : i32, i32, i32
  }
  func.func @transform_5(%arg0: i32) -> (i32, i32, i32) {
    %c0_i32 = arith.constant 0 : i32
    %c0_i32_0 = arith.constant 0 : i32
    %c0_i32_1 = arith.constant 0 : i32
    return %arg0, %c0_i32, %c0_i32_0 : i32, i32, i32
  }
}

</mosaic_0001>

<bundles_post_ra>
// kernel: _run_all.1
= control target key start
LH: loop header
LB: loop body
LE: loop exit
PB: predicated region body
PF: predicated region fallthrough
CT: control target
= control target key end

     0   :  { %10 = vsyncpa [#allocation4], 0  ;;  %s5103_s18 = smov 0   ;;  %s5724_s0 = inlined_call_operand.vmem [shape: f32[20], index: 0, kind: input, shape index: {}]   ;;  %s5725_s1 = inlined_call_operand.vmem [shape: f32[2,16,48], index: 1, kind: input, shape index: {}]   ;;  %s5726_s2 = inlined_call_operand.vmem [shape: f32[2,16,48], index: 2, kind: input, shape index: {}]   ;;  %s5727_s3 = inlined_call_operand.vmem [shape: f32[3,48,48], index: 3, kind: input, shape index: {}]   ;;  %s5728_s4 = inlined_call_operand.vmem [shape: f32[3,48,48], index: 4, kind: input, shape index: {}]   ;;  %s5729_s5 = inlined_call_operand.vmem [shape: f32[2,16,48], index: 5, kind: output, shape index: {}]  }
   0x1 LB: > { %s5109_s19 = sadd.s32 4294967295, %s5069_s18   ;;  %p3592_p0 = scmp.ge.s32.totalorder %s5069_s18, 1  ;;  %s5069_s18 = sphi %s5103_s18, %s16_s18  }
   0x2   : > { %p162_p1 = scmp.lt.s32.totalorder %s5069_s18, 3  ;;  %s175_s22 = sshll.u32 %s5724_s0, 4  ;;  %s176_s22 = int_to_ptr.vmem [resolvable:$true] %s175_s22 }
   0x3   : > { %p5032_p3 = scmp.eq.s32.totalorder %s5109_s19, 0  ;;  %s5044_s24 = scalar_lea.vmem %s176_s22, 16 }
   0x4   : > { %p5116_p2 = pnand %p3592_p0, %p162_p1  ;;  %p5045_p6 = scmp.ne.s32.totalorder %s176_s22, %s5044_s24 }
   0x5   : > { %p5052_p10 = scmp.lt.s32.totalorder %s176_s22, %s176_s22  ;;  %p5053_p11 = scmp.lt.s32.totalorder %s5044_s24, %s5044_s24 }
   0x6   : > { %p5028_p4 = pneg %p5116_p2 }
   0x7   : > { %p5054_p12 = por %p5053_p11, %p5052_p10 }
   0x8   : > { %p5029_p5 = pnand %p5032_p3, %p5028_p4 }
   0xa   : > { %p5046_p7 = pneg %p5029_p5 }
   0xc   : > { %p5047_p8 = pnand %p5046_p7, %p5045_p6 }
   0xe   : > { %p5048_p9 = pneg %p5047_p8 }
  0x10   : > { %p5055_p13 = pnand %p5054_p12, %p5048_p9 }
  0x12   : > { %5058 = shalt.err (!%p5055_p13)
}
  0x13   : > { %s5071_s25 = smov [#allocation3]   ;;  %210 = sbr.rel (%p5116_p2) target bundleno = 2910 (0xb5e), region = 40 }
  0x14   : > { %5031 = dma.vmem_to_smem (!%p5029_p5), %s176_s22, 16, %s5071_s25, [#allocation4]  }
  0x1a   : > { %5064 = dma.done.wait (%p5032_p3), [#allocation4], 16  }
  0x1b   : > { %5066 = vsyncadd (%p5032_p3), [#allocation4], 4294967280 }
  0x1c   : > { %216 = sfence }
  0x1d   : > { %v270_v0 = vld [vmem:[%s5727_s3] sm:$0xff]  ;;  %v271_v1 = vld [vmem:[%s5727_s3 + $0x8] sm:$0xff]  ;;  %v272_v2 = vld [vmem:[%s5727_s3 + $0x10] sm:$0xff]  ;;  %p244_p0 = scmp.lt.s32.totalorder %s5109_s19, 1  ;;  %vm259_vm0 = vcmask 392192   ;;  %v5072_v6 = vmov 0.0  }
  0x1e   : > { %v4596_v3 = vpack.c.bf16 %v271_v1, %v270_v0  ;;  %v273_v4 = vld [vmem:[%s5727_s3 + $0x18] sm:$0xff]  ;;  %v274_v5 = vld [vmem:[%s5727_s3 + $0x20] sm:$0xff]  ;;  %260 = vst.msk [vmem:[#allocation2] sm:$0xff] %vm259_vm0, %v5072_v6  ;;  %261 = vst.msk [vmem:[#allocation2 + $0x8] sm:$0xff] %vm259_vm0, %v5072_v6  ;;  %s539_s11 = sld [smem:[#allocation3]]  ;;  %s3621_s13 = sld [smem:[#allocation3 + $0x1]] }
  0x1f   : > { %262 = vst.msk [vmem:[#allocation2 + $0x10] sm:$0xff] %vm259_vm0, %v5072_v6  ;;  %263 = vst.msk [vmem:[#allocation2 + $0x18] sm:$0xff] %vm259_vm0, %v5072_v6  ;;  %v4600_v7 = vpack.c.bf16 %v273_v4, %v272_v2  ;;  %v275_v8 = vld [vmem:[%s5727_s3 + $0x28] sm:$0xff]  ;;  %v3603_v9 = vld [vmem:[%s5727_s3 + $0x30] sm:$0xff]  ;;  %s5732_s19 = smov (!%p244_p0, %s5109_s19), 1  ;;  %s3640_s15 = sld [smem:[#allocation3 + $0x2]] }
  0x20   : > { %v3604_v10 = vld [vmem:[%s5727_s3 + $0x38] sm:$0xff]  ;;  %4597 = vmatprep.subr.bf16.mxu0 %v4596_v3  ;;  %v3605_v12 = vld [vmem:[%s5727_s3 + $0x40] sm:$0xff]  ;;  %v3606_v13 = vld [vmem:[%s5727_s3 + $0x48] sm:$0xff]  ;;  %s5169_s23 = sshll.u32 %s5732_s19, 4  ;;  %v4604_v16 = vpack.c.bf16 %v275_v8, %v274_v5  ;;  %s3641_s16 = sld [smem:[#allocation3 + $0x3]] }
  0x21   : > { %v4584_v11 = vpack.c.bf16 %v3604_v10, %v3603_v9  ;;  %4599 = vmatpush3.bf16.msra.mxu0 %v4596_v3  ;;  %v4588_v14 = vpack.c.bf16 %v3606_v13, %v3605_v12  ;;  %v3607_v15 = vld [vmem:[%s5727_s3 + $0x50] sm:$0xff]  ;;  %s5178_s28 = scalar_lea.vmem %s5725_s1, %s5169_s23  ;;  %v3613_v17 = vld [vmem:[%s5727_s3 + $0x60] sm:$0xff]  ;;  %v3608_v18 = vld [vmem:[%s5727_s3 + $0x58] sm:$0xff]  ;;  %s5267_s14 = scalar_lea.vmem %s5726_s2, %s5169_s23 }
  0x22   : > { %4601 = vmatprep.subr.bf16.mxu0 %v4600_v7  ;;  %v5187_v19 = vld [vmem:[%s5178_s28] sm:$0xff]  ;;  %v5190_v20 = vld [vmem:[%s5178_s28 + $0x8] sm:$0xff]  ;;  %v4592_v22 = vpack.c.bf16 %v3608_v18, %v3607_v15  ;;  %v3615_v24 = vld [vmem:[%s5727_s3 + $0x70] sm:$0xff]  ;;  %s3660_s17 = sld [smem:[#allocation3 + $0x4]]  ;;  %s3661_s20 = sld [smem:[#allocation3 + $0x5]] }
  0x23   : > { %4585 = vmatprep.subr.bf16.mxu1 %v4584_v11  ;;  %v3614_v21 = vld [vmem:[%s5727_s3 + $0x68] sm:$0xff]  ;;  %266 = vst.msk [vmem:[#allocation2 + $0x8] sm:$0xff] %vm259_vm0, %v5187_v19  ;;  %267 = vst.msk [vmem:[#allocation2 + $0x10] sm:$0xff] %vm259_vm0, %v5190_v20  ;;  %v3616_v25 = vld [vmem:[%s5727_s3 + $0x78] sm:$0xff]  ;;  %s3680_s21 = sld [smem:[#allocation3 + $0x6]]  ;;  %s3681_s22 = sld [smem:[#allocation3 + $0x7]] }
  0x24   : > { %4587 = vmatpush3.bf16.msra.mxu1 %v4584_v11  ;;  %v4608_v23 = vpack.c.bf16 %v3614_v21, %v3613_v17  ;;  %v3617_v26 = vld [vmem:[%s5727_s3 + $0x80] sm:$0xff]  ;;  %v4612_v29 = vpack.c.bf16 %v3616_v25, %v3615_v24  ;;  %v3618_v30 = vld [vmem:[%s5727_s3 + $0x88] sm:$0xff]  ;;  %v3622_v36 = vld [vmem:[%s5728_s4 + $0x30] sm:$0xff]  ;;  %v541_v51 = vstv %s539_s11  ;;  %s3700_s24 = sld [smem:[#allocation3 + $0x8]]  ;;  %s3701_s25 = sld [smem:[#allocation3 + $0x9]] }
  0x25   : > { %4589 = vmatprep.subr.bf16.mxu1 %v4588_v14  ;;  %4603 = vmatpush3.bf16.msra.mxu0 %v4600_v7  ;;  %v4616_v34 = vpack.c.bf16 %v3618_v30, %v3617_v26  ;;  %v3623_v37 = vld [vmem:[%s5728_s4 + $0x38] sm:$0xff]  ;;  %v3624_v39 = vld [vmem:[%s5728_s4 + $0x40] sm:$0xff]  ;;  %v3625_v40 = vld [vmem:[%s5728_s4 + $0x48] sm:$0xff]  ;;  %v827_v24 = vstv %s3621_s13  ;;  %s3720_s26 = sld [smem:[#allocation3 + $0xa]]  ;;  %s258_s29 = scalar_lea.vmem %s5729_s5, %s5169_s23 }
  0x26   : > { %4605 = vmatprep.subr.bf16.mxu0 %v4604_v16  ;;  %v5223_v38 = vpack.c.bf16 %v3623_v37, %v3622_v36  ;;  %v5235_v41 = vpack.c.bf16 %v3625_v40, %v3624_v39  ;;  %v3626_v42 = vld [vmem:[%s5728_s4 + $0x50] sm:$0xff]  ;;  %v3627_v43 = vld [vmem:[%s5728_s4 + $0x58] sm:$0xff]  ;;  %v558_v45 = vld [vmem:[%s5728_s4] sm:$0xff] }
  0x27   : > { %v5247_v44 = vpack.c.bf16 %v3627_v43, %v3626_v42  ;;  %v559_v46 = vld [vmem:[%s5728_s4 + $0x8] sm:$0xff]  ;;  %v5280_v59 = vld [vmem:[%s5267_s14] sm:$0xff]  ;;  %v560_v1 = vld [vmem:[%s5728_s4 + $0x10] sm:$0xff] }
  0x28   : > { %4591 = vmatpush3.bf16.msra.mxu1 %v4588_v14  ;;  %v5259_v47 = vpack.c.bf16 %v559_v46, %v558_v45  ;;  %v5275_v56 = vld [vmem:[%s5267_s14 + $0x8] sm:$0xff]  ;;  %v561_v2 = vld [vmem:[%s5728_s4 + $0x18] sm:$0xff]  ;;  %v562_v6 = vld [vmem:[%s5728_s4 + $0x20] sm:$0xff] }
  0x29   : > { %4593 = vmatprep.subr.bf16.mxu1 %v4592_v22  ;;  %4607 = vmatpush3.bf16.msra.mxu0 %v4604_v16  ;;  %v5295_v4 = vpack.c.bf16 %v561_v2, %v560_v1  ;;  %v563_v7 = vld [vmem:[%s5728_s4 + $0x28] sm:$0xff]  ;;  %v3632_v10 = vld [vmem:[%s5728_s4 + $0x60] sm:$0xff]  ;;  %v3634_v13 = vld [vmem:[%s5728_s4 + $0x70] sm:$0xff] }
  0x2a   : > { %4609 = vmatprep.subr.bf16.mxu0 %v4608_v23  ;;  %v268_v27 = vld [vmem:[#allocation2 + $0x7] sm:$0xff]  ;;  %v269_v28 = vld [vmem:[#allocation2 + $0xf] sm:$0xff]  ;;  %v5308_v9 = vpack.c.bf16 %v563_v7, %v562_v6  ;;  %v3635_v14 = vld [vmem:[%s5728_s4 + $0x78] sm:$0xff] }
  0x2b   : > { %4116 = vmatprep.mubr.msk.f32.mxu0 %vm259_vm0, %v268_v27  ;;  %v447_v31 = vld [vmem:[#allocation2 + $0x9] sm:$0xff]  ;;  %v448_v35 = vld [vmem:[#allocation2 + $0x11] sm:$0xff]  ;;  %v5328_v15 = vpack.c.bf16 %v3635_v14, %v3634_v13  ;;  %v3636_v17 = vld [vmem:[%s5728_s4 + $0x80] sm:$0xff] }
  0x2c   : > { %4595 = vmatpush3.bf16.msra.mxu1 %v4592_v22  ;;  %v276_v32 = vld [vmem:[#allocation2 + $0x8] sm:$0xff]  ;;  %v277_v33 = vld [vmem:[#allocation2 + $0x10] sm:$0xff]  ;;  %4117 = vmatmul.mubr.msk.f32.vlgmr.msra.gmra.mrb[0].mxu0 %vm259_vm0, %v269_v28 }
  0x2d   : > { %4101 = vmatprep.mubr.msk.f32.mxu1 %vm259_vm0, %v276_v32  ;;  %4611 = vmatpush3.bf16.msra.mxu0 %v4608_v23  ;;  %v3633_v11 = vld [vmem:[%s5728_s4 + $0x68] sm:$0xff] }
  0x2e   : > { %4613 = vmatprep.subr.bf16.mxu0 %v4612_v29  ;;  %4131 = vmatprep.mubr.msk.f32.mxu0 %vm259_vm0, %v447_v31  ;;  %v5318_v12 = vpack.c.bf16 %v3633_v11, %v3632_v10  ;;  %v3637_v18 = vld [vmem:[%s5728_s4 + $0x88] sm:$0xff] }
  0x2f   : > { %4102 = vmatmul.mubr.msk.f32.vlgmr.msra.gmra.mrb[0].mxu1 %vm259_vm0, %v277_v33  ;;  %4621 = vmatprep.subr.bf16.mxu1 %v5223_v38  ;;  %v5340_v22 = vpack.c.bf16 %v3637_v18, %v3636_v17 }
  0x30   : > { %4623 = vmatpush3.bf16.msra.mxu1 %v5223_v38 }
  0x31   : > { %4615 = vmatpush3.bf16.msra.mxu0 %v4612_v29  ;;  %4625 = vmatprep.subr.bf16.mxu1 %v5235_v41 }
  0x32   : > { %4617 = vmatprep.subr.bf16.mxu0 %v4616_v34 }
  0x34   : > { %4627 = vmatpush3.bf16.msra.mxu1 %v5235_v41 }
  0x35   : > { %4619 = vmatpush3.bf16.msra.mxu0 %v4616_v34  ;;  %4629 = vmatprep.subr.bf16.mxu1 %v5247_v44  ;;  %v840_v34 = vstv %s3640_s15 }
  0x36   : > { %4657 = vmatprep.subr.bf16.mxu0 %v5223_v38 }
  0x38   : > { %4132 = vmatmul.mubr.msk.f32.vlgmr.msra.gmra.mrb[0].mxu0 %vm259_vm0, %v448_v35  ;;  %4631 = vmatpush3.bf16.msra.mxu1 %v5247_v44 }
  0x39   : > { %4659 = vmatpush3.bf16.msra.mxu0 %v5223_v38  ;;  %4633 = vmatprep.subr.bf16.mxu1 %v5259_v47 }
  0x3a   : > { %4661 = vmatprep.subr.bf16.mxu0 %v5235_v41 }
  0x3d   : > { %4663 = vmatpush3.bf16.msra.mxu0 %v5235_v41 }
  0x3e   : > { %4665 = vmatprep.subr.bf16.mxu0 %v5247_v44 }
  0x41   : > { %4667 = vmatpush3.bf16.msra.mxu0 %v5247_v44 }
  0x42   : > { %4669 = vmatprep.subr.bf16.mxu0 %v5259_v47 }
 0x102   : > { %v4103_v48 = vpop.f32.mrb[0].mxu1 }
 0x103   : > { %v357_v49 = vpop.f32.mrb[1].mxu1 }
 0x10b   : > { %v4133_v50 = vpop.f32.mrb[0].mxu0 }
 0x10c   : > { %v5269_v52 = vadd.f32 %v4133_v50, %v4103_v48  ;;  %v528_v53 = vpop.f32.mrb[1].mxu0 }
 0x10d   : > { %v5271_v54 = vadd.f32 %v528_v53, %v357_v49 }
 0x10e   : > { %v543_v55 = vmul.f32 %v5269_v52, %v541_v51 }
 0x10f   : > { %v542_v57 = vmul.f32 %v5271_v54, %v541_v51 }
 0x110   : > { %v545_v58 = vadd.f32 %v5269_v52, %v543_v55 }
 0x111   : > { %v544_v60 = vadd.f32 %v5271_v54, %v542_v57  ;;  %v1124_v57 = vstv %s3641_s16 }
 0x112   : > { %v549_v61 = vmul.f32 %v5275_v56, %v545_v58 }
 0x113   : > { %v548_v62 = vmul.f32 %v5280_v59, %v544_v60 }
 0x114   : > { %v553_v63 = vadd.f32 %v549_v61, %v5190_v20 }
 0x115   : > { %v552_v0 = vadd.f32 %v548_v62, %v5187_v19 }
 0x116   : > { %555 = vst.msk [vmem:[#allocation2 + $0x10] sm:$0xff] %vm259_vm0, %v553_v63 }
 0x117   : > { %554 = vst.msk [vmem:[#allocation2 + $0x8] sm:$0xff] %vm259_vm0, %v552_v0 }
 0x11d   : > { %v565_v5 = vld [vmem:[#allocation2 + $0x10] sm:$0xff] }
 0x11e   : > { %v564_v3 = vld [vmem:[#allocation2 + $0x8] sm:$0xff]  ;;  %v736_v23 = vld [vmem:[#allocation2 + $0x11] sm:$0xff] }
 0x11f   : > { %4146 = vmatprep.mubr.msk.f32.mxu1 %vm259_vm0, %v564_v3  ;;  %v556_v8 = vld [vmem:[#allocation2 + $0x7] sm:$0xff]  ;;  %v557_v16 = vld [vmem:[#allocation2 + $0xf] sm:$0xff] }
 0x120   : > { %4147 = vmatmul.mubr.msk.f32.vlgmr.msra.gmra.mrb[2].mxu1 %vm259_vm0, %v565_v5  ;;  %v735_v21 = vld [vmem:[#allocation2 + $0x9] sm:$0xff]  ;;  %v1137_v5 = vstv %s3660_s17 }
 0x121   : > { %4635 = vmatpush3.bf16.msra.mxu1 %v5259_v47  ;;  %4161 = vmatprep.mubr.msk.f32.mxu1 %vm259_vm0, %v556_v8 }
 0x122   : > { %4637 = vmatprep.subr.bf16.mxu1 %v5295_v4 }
 0x125   : > { %4639 = vmatpush3.bf16.msra.mxu1 %v5295_v4 }
 0x126   : > { %4641 = vmatprep.subr.bf16.mxu1 %v5308_v9 }
 0x129   : > { %4643 = vmatpush3.bf16.msra.mxu1 %v5308_v9 }
 0x12a   : > { %4645 = vmatprep.subr.bf16.mxu1 %v5318_v12 }
 0x12c   : > { %4162 = vmatmul.mubr.msk.f32.vlgmr.msra.gmra.mrb[2].mxu1 %vm259_vm0, %v557_v16 }
 0x12d   : > { %4647 = vmatpush3.bf16.msra.mxu1 %v5318_v12  ;;  %4176 = vmatprep.mubr.msk.f32.mxu1 %vm259_vm0, %v735_v21 }
 0x12e   : > { %4649 = vmatprep.subr.bf16.mxu1 %v5328_v15 }
 0x131   : > { %4651 = vmatpush3.bf16.msra.mxu1 %v5328_v15 }
 0x132   : > { %4653 = vmatprep.subr.bf16.mxu1 %v5340_v22 }
 0x135   : > { %4655 = vmatpush3.bf16.msra.mxu1 %v5340_v22 }
 0x136   : > { %4693 = vmatprep.subr.bf16.mxu1 %v5223_v38 }
 0x138   : > { %4177 = vmatmul.mubr.msk.f32.vlgmr.msra.gmra.mrb[2].mxu1 %vm259_vm0, %v736_v23 }
 0x139   : > { %4695 = vmatpush3.bf16.msra.mxu1 %v5223_v38 }
 0x13a   : > { %4697 = vmatprep.subr.bf16.mxu1 %v5235_v41 }
 0x13d   : > { %4699 = vmatpush3.bf16.msra.mxu1 %v5235_v41 }
 0x13e   : > { %4701 = vmatprep.subr.bf16.mxu1 %v5247_v44 }
 0x141   : > { %4703 = vmatpush3.bf16.msra.mxu1 %v5247_v44 }
 0x142   : > { %4705 = vmatprep.subr.bf16.mxu1 %v5259_v47 }
 0x20b   : > { %v4178_v25 = vpop.f32.mrb[2].mxu1 }
 0x20c   : > { %v829_v26 = vmul.f32 %v4178_v25, %v827_v24  ;;  %v816_v27 = vpop.f32.mrb[3].mxu1 }
 0x20d   : > { %v828_v28 = vmul.f32 %v827_v24, %v816_v27 }
 0x20e   : > { %v831_v29 = vsub.f32 %v553_v63, %v829_v26 }
 0x20f   : > { %v830_v30 = vsub.f32 %v552_v0, %v828_v28 }
 0x210   : > { %v833_v31 = vmax.f32 %v831_v29, 0.0  ;;  %v1421_v29 = vstv %s3661_s20  ;;  %s3741_s20 = sld [smem:[#allocation3 + $0xd]] }
 0x211   : > { %v832_v32 = vmax.f32 %v830_v30, 0.0 }
 0x212   : > { %v835_v33 = vmin.f32 %v833_v31, 255.0 }
 0x213   : > { %v834_v35 = vmin.f32 %v832_v32, 255.0 }
 0x214   : > { %v839_v36 = vsub.f32 %v835_v33, %v5269_v52 }
 0x215   : > { %v838_v37 = vsub.f32 %v834_v35, %v5271_v54 }
 0x216   : > { %v842_v39 = vmul.f32 %v840_v34, %v839_v36 }
 0x217   : > { %v841_v40 = vmul.f32 %v840_v34, %v838_v37 }
 0x218   : > { %v844_v42 = vadd.f32 %v842_v39, %v835_v33 }
 0x219   : > { %v843_v43 = vadd.f32 %v841_v40, %v834_v35  ;;  %v1434_v40 = vstv %s3680_s21  ;;  %s3721_s21 = sld [smem:[#allocation3 + $0xb]] }
 0x21a   : > { %v848_v45 = vmul.f32 %v844_v42, %v5275_v56 }
 0x21b   : > { %v847_v46 = vmul.f32 %v843_v43, %v5280_v59 }
 0x21c   : > { %v852_v48 = vadd.f32 %v848_v45, %v5190_v20 }
 0x21d   : > { %v851_v49 = vadd.f32 %v847_v46, %v5187_v19 }
 0x21e   : > { %854 = vst.msk [vmem:[#allocation2 + $0x10] sm:$0xff] %vm259_vm0, %v852_v48 }
 0x21f   : > { %853 = vst.msk [vmem:[#allocation2 + $0x8] sm:$0xff] %vm259_vm0, %v851_v49 }
 0x225   : > { %v864_v51 = vld [vmem:[#allocation2 + $0x10] sm:$0xff] }
 0x226   : > { %v863_v50 = vld [vmem:[#allocation2 + $0x8] sm:$0xff]  ;;  %v1034_v55 = vld [vmem:[#allocation2 + $0x11] sm:$0xff] }
 0x227   : > { %4191 = vmatprep.mubr.msk.f32.mxu0 %vm259_vm0, %v863_v50  ;;  %v855_v52 = vld [vmem:[#allocation2 + $0x7] sm:$0xff]  ;;  %v856_v53 = vld [vmem:[#allocation2 + $0xf] sm:$0xff] }
 0x228   : > { %4192 = vmatmul.mubr.msk.f32.vlgmr.msra.gmra.mrb[2].mxu0 %vm259_vm0, %v864_v51  ;;  %v1033_v54 = vld [vmem:[#allocation2 + $0x9] sm:$0xff] }
 0x229   : > { %4671 = vmatpush3.bf16.msra.mxu0 %v5259_v47  ;;  %4206 = vmatprep.mubr.msk.f32.mxu0 %vm259_vm0, %v855_v52 }
 0x22a   : > { %4673 = vmatprep.subr.bf16.mxu0 %v5295_v4 }
 0x22d   : > { %4675 = vmatpush3.bf16.msra.mxu0 %v5295_v4 }
 0x22e   : > { %4677 = vmatprep.subr.bf16.mxu0 %v5308_v9 }
 0x231   : > { %4679 = vmatpush3.bf16.msra.mxu0 %v5308_v9 }
 0x232   : > { %4681 = vmatprep.subr.bf16.mxu0 %v5318_v12 }
 0x234   : > { %4207 = vmatmul.mubr.msk.f32.vlgmr.msra.gmra.mrb[2].mxu0 %vm259_vm0, %v856_v53 }
 0x235   : > { %4683 = vmatpush3.bf16.msra.mxu0 %v5318_v12  ;;  %4221 = vmatprep.mubr.msk.f32.mxu0 %vm259_vm0, %v1033_v54 }
 0x236   : > { %4685 = vmatprep.subr.bf16.mxu0 %v5328_v15 }
 0x239   : > { %4687 = vmatpush3.bf16.msra.mxu0 %v5328_v15 }
 0x23a   : > { %4689 = vmatprep.subr.bf16.mxu0 %v5340_v22 }
 0x23d   : > { %4691 = vmatpush3.bf16.msra.mxu0 %v5340_v22 }
 0x23e   : > { %4729 = vmatprep.subr.bf16.mxu0 %v5223_v38 }
 0x240   : > { %4222 = vmatmul.mubr.msk.f32.vlgmr.msra.gmra.mrb[2].mxu0 %vm259_vm0, %v1034_v55 }
 0x241   : > { %4731 = vmatpush3.bf16.msra.mxu0 %v5223_v38 }
 0x242   : > { %4733 = vmatprep.subr.bf16.mxu0 %v5235_v41 }
 0x245   : > { %4735 = vmatpush3.bf16.msra.mxu0 %v5235_v41 }
 0x246   : > { %4737 = vmatprep.subr.bf16.mxu0 %v5247_v44 }
 0x249   : > { %4739 = vmatpush3.bf16.msra.mxu0 %v5247_v44 }
 0x24a   : > { %4741 = vmatprep.subr.bf16.mxu0 %v5259_v47 }
 0x313   : > { %v4223_v58 = vpop.f32.mrb[2].mxu0 }
 0x314   : > { %v1126_v60 = vmul.f32 %v4223_v58, %v1124_v57  ;;  %v1113_v61 = vpop.f32.mrb[3].mxu0 }
 0x315   : > { %v1125_v62 = vmul.f32 %v1124_v57, %v1113_v61 }
 0x316   : > { %v1128_v63 = vsub.f32 %v852_v48, %v1126_v60 }
 0x317   : > { %v1127_v0 = vsub.f32 %v851_v49, %v1125_v62 }
 0x318   : > { %v1130_v1 = vmax.f32 %v1128_v63, 0.0  ;;  %v1718_v63 = vstv %s3681_s22  ;;  %s3740_s22 = sld [smem:[#allocation3 + $0xc]] }
 0x319   : > { %v1129_v2 = vmax.f32 %v1127_v0, 0.0 }
 0x31a   : > { %v1132_v3 = vmin.f32 %v1130_v1, 255.0 }
 0x31b   : > { %v1131_v6 = vmin.f32 %v1129_v2, 255.0 }
 0x31c   : > { %v1136_v7 = vsub.f32 %v1132_v3, %v835_v33 }
 0x31d   : > { %v1135_v8 = vsub.f32 %v1131_v6, %v834_v35 }
 0x31e   : > { %v1139_v10 = vmul.f32 %v1137_v5, %v1136_v7 }
 0x31f   : > { %v1138_v11 = vmul.f32 %v1137_v5, %v1135_v8 }
 0x320   : > { %v1141_v13 = vadd.f32 %v1139_v10, %v1132_v3  ;;  %v1731_v10 = vstv %s3700_s24  ;;  %s3781_s24 = sld [smem:[#allocation3 + $0x11]] }
 0x321   : > { %v1140_v14 = vadd.f32 %v1138_v11, %v1131_v6 }
 0x322   : > { %v1145_v16 = vmul.f32 %v1141_v13, %v5275_v56 }
 0x323   : > { %v1144_v17 = vmul.f32 %v1140_v14, %v5280_v59 }
 0x324   : > { %v1149_v18 = vadd.f32 %v1145_v16, %v5190_v20 }
 0x325   : > { %v1148_v21 = vadd.f32 %v1144_v17, %v5187_v19 }
 0x326   : > { %1151 = vst.msk [vmem:[#allocation2 + $0x10] sm:$0xff] %vm259_vm0, %v1149_v18 }
 0x327   : > { %1150 = vst.msk [vmem:[#allocation2 + $0x8] sm:$0xff] %vm259_vm0, %v1148_v21 }
 0x32d   : > { %v1161_v24 = vld [vmem:[#allocation2 + $0x10] sm:$0xff] }
 0x32e   : > { %v1160_v23 = vld [vmem:[#allocation2 + $0x8] sm:$0xff]  ;;  %v1331_v28 = vld [vmem:[#allocation2 + $0x11] sm:$0xff] }
 0x32f   : > { %4236 = vmatprep.mubr.msk.f32.mxu1 %vm259_vm0, %v1160_v23  ;;  %v1152_v25 = vld [vmem:[#allocation2 + $0x7] sm:$0xff]  ;;  %v1153_v26 = vld [vmem:[#allocation2 + $0xf] sm:$0xff] }
 0x330   : > { %4237 = vmatmul.mubr.msk.f32.vlgmr.msra.gmra.mrb[4].mxu1 %vm259_vm0, %v1161_v24  ;;  %v1330_v27 = vld [vmem:[#allocation2 + $0x9] sm:$0xff] }
 0x331   : > { %4707 = vmatpush3.bf16.msra.mxu1 %v5259_v47  ;;  %4251 = vmatprep.mubr.msk.f32.mxu1 %vm259_vm0, %v1152_v25 }
 0x332   : > { %4709 = vmatprep.subr.bf16.mxu1 %v5295_v4 }
 0x335   : > { %4711 = vmatpush3.bf16.msra.mxu1 %v5295_v4 }
 0x336   : > { %4713 = vmatprep.subr.bf16.mxu1 %v5308_v9 }
 0x339   : > { %4715 = vmatpush3.bf16.msra.mxu1 %v5308_v9 }
 0x33a   : > { %4717 = vmatprep.subr.bf16.mxu1 %v5318_v12 }
 0x33c   : > { %4252 = vmatmul.mubr.msk.f32.vlgmr.msra.gmra.mrb[4].mxu1 %vm259_vm0, %v1153_v26 }
 0x33d   : > { %4719 = vmatpush3.bf16.msra.mxu1 %v5318_v12  ;;  %4266 = vmatprep.mubr.msk.f32.mxu1 %vm259_vm0, %v1330_v27 }
 0x33e   : > { %4721 = vmatprep.subr.bf16.mxu1 %v5328_v15 }
 0x341   : > { %4723 = vmatpush3.bf16.msra.mxu1 %v5328_v15 }
 0x342   : > { %4725 = vmatprep.subr.bf16.mxu1 %v5340_v22 }
 0x345   : > { %4727 = vmatpush3.bf16.msra.mxu1 %v5340_v22 }
 0x346   : > { %4765 = vmatprep.subr.bf16.mxu1 %v5223_v38 }
 0x348   : > { %4267 = vmatmul.mubr.msk.f32.vlgmr.msra.gmra.mrb[4].mxu1 %vm259_vm0, %v1331_v28 }
 0x349   : > { %4767 = vmatpush3.bf16.msra.mxu1 %v5223_v38 }
 0x34a   : > { %4769 = vmatprep.subr.bf16.mxu1 %v5235_v41 }
 0x34d   : > { %4771 = vmatpush3.bf16.msra.mxu1 %v5235_v41 }
 0x34e   : > { %4773 = vmatprep.subr.bf16.mxu1 %v5247_v44 }
 0x351   : > { %4775 = vmatpush3.bf16.msra.mxu1 %v5247_v44 }
 0x352   : > { %4777 = vmatprep.subr.bf16.mxu1 %v5259_v47 }
 0x41b   : > { %v4268_v30 = vpop.f32.mrb[4].mxu1 }
 0x41c   : > { %v1423_v31 = vmul.f32 %v4268_v30, %v1421_v29  ;;  %v1410_v32 = vpop.f32.mrb[5].mxu1 }
 0x41d   : > { %v1422_v33 = vmul.f32 %v1421_v29, %v1410_v32 }
 0x41e   : > { %v1425_v34 = vsub.f32 %v1149_v18, %v1423_v31  ;;  %v2015_v31 = vstv %s3701_s25  ;;  %s3800_s25 = sld [smem:[#allocation3 + $0x12]] }
 0x41f   : > { %v1424_v35 = vsub.f32 %v1148_v21, %v1422_v33 }
 0x420   : > { %v1427_v36 = vmax.f32 %v1425_v34, 0.0 }
 0x421   : > { %v1426_v37 = vmax.f32 %v1424_v35, 0.0 }
 0x422   : > { %v1429_v39 = vmin.f32 %v1427_v36, 255.0 }
 0x423   : > { %v1428_v42 = vmin.f32 %v1426_v37, 255.0 }
 0x424   : > { %v1433_v43 = vsub.f32 %v1429_v39, %v1132_v3 }
 0x425   : > { %v1432_v45 = vsub.f32 %v1428_v42, %v1131_v6 }
 0x426   : > { %v1436_v46 = vmul.f32 %v1434_v40, %v1433_v43  ;;  %v2028_v43 = vstv %s3720_s26  ;;  %s3801_s26 = sld [smem:[#allocation3 + $0x13]] }
 0x427   : > { %v1435_v48 = vmul.f32 %v1434_v40, %v1432_v45 }
 0x428   : > { %v1438_v49 = vadd.f32 %v1436_v46, %v1429_v39 }
 0x429   : > { %v1437_v50 = vadd.f32 %v1435_v48, %v1428_v42 }
 0x42a   : > { %v1442_v51 = vmul.f32 %v1438_v49, %v5275_v56 }
 0x42b   : > { %v1441_v52 = vmul.f32 %v1437_v50, %v5280_v59 }
 0x42c   : > { %v1446_v53 = vadd.f32 %v1442_v51, %v5190_v20 }
 0x42d   : > { %v1445_v54 = vadd.f32 %v1441_v52, %v5187_v19 }
 0x42e   : > { %1448 = vst.msk [vmem:[#allocation2 + $0x10] sm:$0xff] %vm259_vm0, %v1446_v53 }
 0x42f   : > { %1447 = vst.msk [vmem:[#allocation2 + $0x8] sm:$0xff] %vm259_vm0, %v1445_v54 }
 0x435   : > { %v1458_v57 = vld [vmem:[#allocation2 + $0x10] sm:$0xff] }
 0x436   : > { %v1457_v55 = vld [vmem:[#allocation2 + $0x8] sm:$0xff]  ;;  %v1628_v62 = vld [vmem:[#allocation2 + $0x11] sm:$0xff] }
 0x437   : > { %4281 = vmatprep.mubr.msk.f32.mxu0 %vm259_vm0, %v1457_v55  ;;  %v1449_v58 = vld [vmem:[#allocation2 + $0x7] sm:$0xff]  ;;  %v1450_v60 = vld [vmem:[#allocation2 + $0xf] sm:$0xff] }
 0x438   : > { %4282 = vmatmul.mubr.msk.f32.vlgmr.msra.gmra.mrb[4].mxu0 %vm259_vm0, %v1458_v57  ;;  %v1627_v61 = vld [vmem:[#allocation2 + $0x9] sm:$0xff] }
 0x439   : > { %4743 = vmatpush3.bf16.msra.mxu0 %v5259_v47  ;;  %4296 = vmatprep.mubr.msk.f32.mxu0 %vm259_vm0, %v1449_v58 }
 0x43a   : > { %4745 = vmatprep.subr.bf16.mxu0 %v5295_v4 }
 0x43d   : > { %4747 = vmatpush3.bf16.msra.mxu0 %v5295_v4 }
 0x43e   : > { %4749 = vmatprep.subr.bf16.mxu0 %v5308_v9 }
 0x441   : > { %4751 = vmatpush3.bf16.msra.mxu0 %v5308_v9 }
 0x442   : > { %4753 = vmatprep.subr.bf16.mxu0 %v5318_v12 }
 0x444   : > { %4297 = vmatmul.mubr.msk.f32.vlgmr.msra.gmra.mrb[4].mxu0 %vm259_vm0, %v1450_v60 }
 0x445   : > { %4755 = vmatpush3.bf16.msra.mxu0 %v5318_v12  ;;  %4311 = vmatprep.mubr.msk.f32.mxu0 %vm259_vm0, %v1627_v61 }
 0x446   : > { %4757 = vmatprep.subr.bf16.mxu0 %v5328_v15 }
 0x449   : > { %4759 = vmatpush3.bf16.msra.mxu0 %v5328_v15 }
 0x44a   : > { %4761 = vmatprep.subr.bf16.mxu0 %v5340_v22 }
 0x44d   : > { %4763 = vmatpush3.bf16.msra.mxu0 %v5340_v22 }
 0x44e   : > { %4801 = vmatprep.subr.bf16.mxu0 %v5223_v38 }
 0x450   : > { %4312 = vmatmul.mubr.msk.f32.vlgmr.msra.gmra.mrb[4].mxu0 %vm259_vm0, %v1628_v62  ;;  %v3747_v62 = vld [vmem:[%s5728_s4 + $0x58] sm:$0xff] }
 0x451   : > { %4803 = vmatpush3.bf16.msra.mxu0 %v5223_v38 }
 0x452   : > { %4805 = vmatprep.subr.bf16.mxu0 %v5235_v41 }
 0x455   : > { %4807 = vmatpush3.bf16.msra.mxu0 %v5235_v41 }
 0x456   : > { %4809 = vmatprep.subr.bf16.mxu0 %v5247_v44 }
 0x459   : > { %4811 = vmatpush3.bf16.msra.mxu0 %v5247_v44 }
 0x45a   : > { %4813 = vmatprep.subr.bf16.mxu0 %v5259_v47 }
 0x523   : > { %v4313_v0 = vpop.f32.mrb[4].mxu0 }
 0x524   : > { %v1720_v1 = vmul.f32 %v4313_v0, %v1718_v63  ;;  %v1707_v2 = vpop.f32.mrb[5].mxu0  ;;  %v2342_v0 = vld [vmem:[%s5728_s4] sm:$0xff] }
 0x525   : > { %v1719_v3 = vmul.f32 %v1718_v63, %v1707_v2 }
 0x526   : > { %v1722_v5 = vsub.f32 %v1446_v53, %v1720_v1  ;;  %v2343_v1 = vld [vmem:[%s5728_s4 + $0x8] sm:$0xff] }
 0x527   : > { %v1721_v6 = vsub.f32 %v1445_v54, %v1719_v3  ;;  %v5541_v2 = vpack.c.bf16 %v2343_v1, %v2342_v0  ;;  %v2312_v3 = vstv %s3721_s21  ;;  %s3760_s21 = sld [smem:[#allocation3 + $0xe]] }
 0x528   : > { %v1724_v38 = vmax.f32 %v1722_v5, 0.0 }
 0x529   : > { %v1723_v7 = vmax.f32 %v1721_v6, 0.0 }
 0x52a   : > { %v1726_v8 = vmin.f32 %v1724_v38, 255.0 }
 0x52b   : > { %v1725_v41 = vmin.f32 %v1723_v7, 255.0 }
 0x52c   : > { %v1730_v11 = vsub.f32 %v1726_v8, %v1429_v39 }
 0x52d   : > { %v1729_v13 = vsub.f32 %v1725_v41, %v1428_v42 }
 0x52e   : > { %v1733_v14 = vmul.f32 %v1731_v10, %v1730_v11 }
 0x52f   : > { %v1732_v44 = vmul.f32 %v1731_v10, %v1729_v13 }
 0x530   : > { %v1735_v16 = vadd.f32 %v1733_v14, %v1726_v8  ;;  %v2325_v14 = vstv %s3740_s22  ;;  %s3761_s22 = sld [smem:[#allocation3 + $0xf]] }
 0x531   : > { %v1734_v17 = vadd.f32 %v1732_v44, %v1725_v41 }
 0x532   : > { %v1739_v18 = vmul.f32 %v1735_v16, %v5275_v56 }
 0x533   : > { %v1738_v21 = vmul.f32 %v1734_v17, %v5280_v59 }
 0x534   : > { %v1743_v23 = vadd.f32 %v1739_v18, %v5190_v20 }
 0x535   : > { %v1742_v24 = vadd.f32 %v1738_v21, %v5187_v19  ;;  %v5554_v21 = vld [vmem:[%s5267_s14 + $0x8] sm:$0xff] }
 0x536   : > { %1745 = vst.msk [vmem:[#allocation2 + $0x10] sm:$0xff] %vm259_vm0, %v1743_v23 }
 0x537   : > { %1744 = vst.msk [vmem:[#allocation2 + $0x8] sm:$0xff] %vm259_vm0, %v1742_v24 }
 0x53d   : > { %v1755_v26 = vld [vmem:[#allocation2 + $0x10] sm:$0xff] }
 0x53e   : > { %v1754_v25 = vld [vmem:[#allocation2 + $0x8] sm:$0xff]  ;;  %v1925_v30 = vld [vmem:[#allocation2 + $0x11] sm:$0xff] }
 0x53f   : > { %4326 = vmatprep.mubr.msk.f32.mxu1 %vm259_vm0, %v1754_v25  ;;  %v1746_v27 = vld [vmem:[#allocation2 + $0x7] sm:$0xff]  ;;  %v1747_v28 = vld [vmem:[#allocation2 + $0xf] sm:$0xff] }
 0x540   : > { %4327 = vmatmul.mubr.msk.f32.vlgmr.msra.gmra.mrb[6].mxu1 %vm259_vm0, %v1755_v26  ;;  %v1924_v29 = vld [vmem:[#allocation2 + $0x9] sm:$0xff]  ;;  %v5558_v25 = vld [vmem:[%s5267_s14] sm:$0xff]  ;;  %s3780_s14 = sld [smem:[#allocation3 + $0x10]] }
 0x541   : > { %4779 = vmatpush3.bf16.msra.mxu1 %v5259_v47  ;;  %4341 = vmatprep.mubr.msk.f32.mxu1 %vm259_vm0, %v1746_v27  ;;  %v5561_v26 = vld [vmem:[%s5178_s28 + $0x8] sm:$0xff] }
 0x542   : > { %4781 = vmatprep.subr.bf16.mxu1 %v5295_v4 }
 0x545   : > { %4783 = vmatpush3.bf16.msra.mxu1 %v5295_v4 }
 0x546   : > { %4785 = vmatprep.subr.bf16.mxu1 %v5308_v9 }
 0x549   : > { %4787 = vmatpush3.bf16.msra.mxu1 %v5308_v9 }
 0x54a   : > { %4789 = vmatprep.subr.bf16.mxu1 %v5318_v12 }
 0x54c   : > { %4342 = vmatmul.mubr.msk.f32.vlgmr.msra.gmra.mrb[6].mxu1 %vm259_vm0, %v1747_v28 }
 0x54d   : > { %4791 = vmatpush3.bf16.msra.mxu1 %v5318_v12  ;;  %4356 = vmatprep.mubr.msk.f32.mxu1 %vm259_vm0, %v1924_v29  ;;  %v5566_v29 = vld [vmem:[%s5178_s28] sm:$0xff] }
 0x54e   : > { %4793 = vmatprep.subr.bf16.mxu1 %v5328_v15 }
 0x551   : > { %4795 = vmatpush3.bf16.msra.mxu1 %v5328_v15 }
 0x552   : > { %4797 = vmatprep.subr.bf16.mxu1 %v5340_v22 }
 0x555   : > { %4799 = vmatpush3.bf16.msra.mxu1 %v5340_v22 }
 0x558   : > { %4357 = vmatmul.mubr.msk.f32.vlgmr.msra.gmra.mrb[6].mxu1 %vm259_vm0, %v1925_v30 }
 0x62b   : > { %v4358_v32 = vpop.f32.mrb[6].mxu1 }
 0x62c   : > { %v2017_v33 = vmul.f32 %v4358_v32, %v2015_v31  ;;  %v2004_v34 = vpop.f32.mrb[7].mxu1 }
 0x62d   : > { %v2016_v35 = vmul.f32 %v2015_v31, %v2004_v34  ;;  %v2345_v34 = vld [vmem:[%s5728_s4 + $0x18] sm:$0xff] }
 0x62e   : > { %v2019_v36 = vsub.f32 %v1743_v23, %v2017_v33  ;;  %v2344_v33 = vld [vmem:[%s5728_s4 + $0x10] sm:$0xff] }
 0x62f   : > { %v2018_v37 = vsub.f32 %v1742_v24, %v2016_v35 }
 0x630   : > { %v2021_v39 = vmax.f32 %v2019_v36, 0.0  ;;  %v5579_v36 = vpack.c.bf16 %v2345_v34, %v2344_v33 }
 0x631   : > { %v2020_v40 = vmax.f32 %v2018_v37, 0.0 }
 0x632   : > { %v5468_v42 = vmin.f32 %v2021_v39, 255.0  ;;  %v2346_v39 = vld [vmem:[%s5728_s4 + $0x20] sm:$0xff] }
 0x633   : > { %v5470_v45 = vmin.f32 %v2020_v40, 255.0  ;;  %v2347_v40 = vld [vmem:[%s5728_s4 + $0x28] sm:$0xff] }
 0x634   : > { %v2027_v46 = vsub.f32 %v5468_v42, %v1726_v8 }
 0x635   : > { %v2026_v48 = vsub.f32 %v5470_v45, %v1725_v41 }
 0x636   : > { %v2030_v49 = vmul.f32 %v2028_v43, %v2027_v46  ;;  %v3753_v46 = vld [vmem:[%s5728_s4 + $0x68] sm:$0xff] }
 0x637   : > { %v2029_v50 = vmul.f32 %v2028_v43, %v2026_v48  ;;  %v5592_v43 = vpack.c.bf16 %v2347_v40, %v2346_v39 }
 0x638   : > { %v2032_v51 = vadd.f32 %v2030_v49, %v5468_v42  ;;  %v3754_v49 = vld [vmem:[%s5728_s4 + $0x70] sm:$0xff] }
 0x639   : > { %v2031_v52 = vadd.f32 %v2029_v50, %v5470_v45  ;;  %v3755_v50 = vld [vmem:[%s5728_s4 + $0x78] sm:$0xff] }
 0x63a   : > { %v2036_v53 = vmul.f32 %v2032_v51, %v5275_v56  ;;  %v3742_v56 = vld [vmem:[%s5728_s4 + $0x30] sm:$0xff]  ;;  %v5612_v51 = vpack.c.bf16 %v3755_v50, %v3754_v49 }
 0x63b   : > { %v2035_v54 = vmul.f32 %v2031_v52, %v5280_v59  ;;  %v3743_v59 = vld [vmem:[%s5728_s4 + $0x38] sm:$0xff] }
 0x63c   : > { %v2040_v55 = vadd.f32 %v2036_v53, %v5190_v20  ;;  %v3756_v53 = vld [vmem:[%s5728_s4 + $0x80] sm:$0xff] }
 0x63d   : > { %v2039_v57 = vadd.f32 %v2035_v54, %v5187_v19  ;;  %v3757_v54 = vld [vmem:[%s5728_s4 + $0x88] sm:$0xff] }
 0x63e   : > { %2042 = vst.msk [vmem:[#allocation2 + $0x10] sm:$0xff] %vm259_vm0, %v2040_v55 }
 0x63f   : > { %2041 = vst.msk [vmem:[#allocation2 + $0x8] sm:$0xff] %vm259_vm0, %v2039_v57 }
 0x645   : > { %v2052_v60 = vld [vmem:[#allocation2 + $0x10] sm:$0xff] }
 0x646   : > { %v2051_v58 = vld [vmem:[#allocation2 + $0x8] sm:$0xff] }
 0x647   : > { %4371 = vmatprep.mubr.msk.f32.mxu0 %vm259_vm0, %v2051_v58  ;;  %v2043_v61 = vld [vmem:[#allocation2 + $0x7] sm:$0xff]  ;;  %v2044_v19 = vld [vmem:[#allocation2 + $0xf] sm:$0xff] }
 0x648   : > { %4372 = vmatmul.mubr.msk.f32.vlgmr.msra.gmra.mrb[6].mxu0 %vm259_vm0, %v2052_v60  ;;  %v2221_v20 = vld [vmem:[#allocation2 + $0x9] sm:$0xff]  ;;  %v2609_v60 = vstv %s3741_s20 }
 0x649   : > { %4815 = vmatpush3.bf16.msra.mxu0 %v5259_v47  ;;  %4386 = vmatprep.mubr.msk.f32.mxu0 %vm259_vm0, %v2043_v61  ;;  %v2222_v47 = vld [vmem:[#allocation2 + $0x11] sm:$0xff] }
 0x64a   : > { %4817 = vmatprep.subr.bf16.mxu0 %v5295_v4 }
 0x64d   : > { %4819 = vmatpush3.bf16.msra.mxu0 %v5295_v4  ;;  %v5505_v4 = vpack.c.bf16 %v3743_v59, %v3742_v56 }
 0x64e   : > { %4821 = vmatprep.subr.bf16.mxu0 %v5308_v9 }
 0x64f   : > { %4837 = vmatprep.subr.bf16.mxu1 %v5505_v4 }
 0x650   : > { %4839 = vmatpush3.bf16.msra.mxu1 %v5505_v4 }
 0x651   : > { %4823 = vmatpush3.bf16.msra.mxu0 %v5308_v9  ;;  %v3744_v9 = vld [vmem:[%s5728_s4 + $0x40] sm:$0xff] }
 0x652   : > { %4825 = vmatprep.subr.bf16.mxu0 %v5318_v12 }
 0x654   : > { %4387 = vmatmul.mubr.msk.f32.vlgmr.msra.gmra.mrb[6].mxu0 %vm259_vm0, %v2044_v19 }
 0x655   : > { %4827 = vmatpush3.bf16.msra.mxu0 %v5318_v12  ;;  %4401 = vmatprep.mubr.msk.f32.mxu0 %vm259_vm0, %v2221_v20  ;;  %v3745_v12 = vld [vmem:[%s5728_s4 + $0x48] sm:$0xff] }
 0x656   : > { %4829 = vmatprep.subr.bf16.mxu0 %v5328_v15 }
 0x659   : > { %4831 = vmatpush3.bf16.msra.mxu0 %v5328_v15  ;;  %v5517_v15 = vpack.c.bf16 %v3745_v12, %v3744_v9 }
 0x65a   : > { %4833 = vmatprep.subr.bf16.mxu0 %v5340_v22 }
 0x65b   : > { %4841 = vmatprep.subr.bf16.mxu1 %v5517_v15 }
 0x65c   : > { %4843 = vmatpush3.bf16.msra.mxu1 %v5517_v15 }
 0x65d   : > { %4835 = vmatpush3.bf16.msra.mxu0 %v5340_v22  ;;  %v3746_v22 = vld [vmem:[%s5728_s4 + $0x50] sm:$0xff] }
 0x65e   : > { %4873 = vmatprep.subr.bf16.mxu0 %v5505_v4  ;;  %v5528_v63 = vpack.c.bf16 %v3747_v62, %v3746_v22  ;;  %v2622_v62 = vstv %s3760_s21 }
 0x660   : > { %4402 = vmatmul.mubr.msk.f32.vlgmr.msra.gmra.mrb[6].mxu0 %vm259_vm0, %v2222_v47  ;;  %4845 = vmatprep.subr.bf16.mxu1 %v5528_v63 }
 0x661   : > { %4875 = vmatpush3.bf16.msra.mxu0 %v5505_v4  ;;  %4847 = vmatpush3.bf16.msra.mxu1 %v5528_v63 }
 0x662   : > { %4877 = vmatprep.subr.bf16.mxu0 %v5517_v15  ;;  %4849 = vmatprep.subr.bf16.mxu1 %v5541_v2 }
 0x665   : > { %4879 = vmatpush3.bf16.msra.mxu0 %v5517_v15 }
 0x666   : > { %4881 = vmatprep.subr.bf16.mxu0 %v5528_v63 }
 0x669   : > { %4883 = vmatpush3.bf16.msra.mxu0 %v5528_v63 }
 0x66a   : > { %4885 = vmatprep.subr.bf16.mxu0 %v5541_v2 }
 0x733   : > { %v4403_v5 = vpop.f32.mrb[6].mxu0 }
 0x734   : > { %v2314_v6 = vmul.f32 %v4403_v5, %v2312_v3  ;;  %v2301_v38 = vpop.f32.mrb[7].mxu0 }
 0x735   : > { %v2313_v7 = vmul.f32 %v2312_v3, %v2301_v38 }
 0x736   : > { %v2316_v8 = vsub.f32 %v2040_v55, %v2314_v6 }
 0x737   : > { %v2315_v10 = vsub.f32 %v2039_v57, %v2313_v7  ;;  %v5624_v57 = vpack.c.bf16 %v3757_v54, %v3756_v53 }
 0x738   : > { %v2318_v41 = vmax.f32 %v2316_v8, 0.0 }
 0x739   : > { %v2317_v11 = vmax.f32 %v2315_v10, 0.0 }
 0x73a   : > { %v5545_v13 = vmin.f32 %v2318_v41, 255.0 }
 0x73b   : > { %v5547_v44 = vmin.f32 %v2317_v11, 255.0 }
 0x73c   : > { %v2324_v16 = vsub.f32 %v5545_v13, %v5468_v42 }
 0x73d   : > { %v2323_v17 = vsub.f32 %v5547_v44, %v5470_v45  ;;  %v3752_v45 = vld [vmem:[%s5728_s4 + $0x60] sm:$0xff] }
 0x73e   : > { %v2327_v18 = vmul.f32 %v2325_v14, %v2324_v16  ;;  %v5602_v48 = vpack.c.bf16 %v3753_v46, %v3752_v45 }
 0x73f   : > { %v2326_v23 = vmul.f32 %v2325_v14, %v2323_v17 }
 0x740   : > { %v2329_v24 = vadd.f32 %v2327_v18, %v5545_v13 }
 0x741   : > { %v2328_v27 = vadd.f32 %v2326_v23, %v5547_v44  ;;  %v2906_v23 = vstv %s3761_s22 }
 0x742   : > { %v2333_v28 = vmul.f32 %v5554_v21, %v2329_v24 }
 0x743   : > { %v2332_v30 = vmul.f32 %v5558_v25, %v2328_v27 }
 0x744   : > { %v2337_v31 = vadd.f32 %v5561_v26, %v2333_v28 }
 0x745   : > { %v2336_v32 = vadd.f32 %v5566_v29, %v2332_v30 }
 0x746   : > { %2339 = vst.msk [vmem:[#allocation2 + $0x10] sm:$0xff] %vm259_vm0, %v2337_v31 }
 0x747   : > { %2338 = vst.msk [vmem:[#allocation2 + $0x8] sm:$0xff] %vm259_vm0, %v2336_v32 }
 0x74d   : > { %v2349_v37 = vld [vmem:[#allocation2 + $0x10] sm:$0xff] }
 0x74e   : > { %v2348_v35 = vld [vmem:[#allocation2 + $0x8] sm:$0xff]  ;;  %v2519_v58 = vld [vmem:[#allocation2 + $0x11] sm:$0xff] }
 0x74f   : > { %4416 = vmatprep.mubr.msk.f32.mxu1 %vm259_vm0, %v2348_v35  ;;  %v2340_v42 = vld [vmem:[#allocation2 + $0x7] sm:$0xff]  ;;  %v2341_v52 = vld [vmem:[#allocation2 + $0xf] sm:$0xff]  ;;  %v2919_v35 = vstv %s3780_s14 }
 0x750   : > { %4417 = vmatmul.mubr.msk.f32.vlgmr.msra.gmra.mrb[8].mxu1 %vm259_vm0, %v2349_v37  ;;  %v2518_v55 = vld [vmem:[#allocation2 + $0x9] sm:$0xff] }
 0x751   : > { %4851 = vmatpush3.bf16.msra.mxu1 %v5541_v2  ;;  %4431 = vmatprep.mubr.msk.f32.mxu1 %vm259_vm0, %v2340_v42 }
 0x752   : > { %4853 = vmatprep.subr.bf16.mxu1 %v5579_v36 }
 0x755   : > { %4855 = vmatpush3.bf16.msra.mxu1 %v5579_v36 }
 0x756   : > { %4857 = vmatprep.subr.bf16.mxu1 %v5592_v43 }
 0x759   : > { %4859 = vmatpush3.bf16.msra.mxu1 %v5592_v43 }
 0x75a   : > { %4861 = vmatprep.subr.bf16.mxu1 %v5602_v48 }
 0x75c   : > { %4432 = vmatmul.mubr.msk.f32.vlgmr.msra.gmra.mrb[8].mxu1 %vm259_vm0, %v2341_v52 }
 0x75d   : > { %4863 = vmatpush3.bf16.msra.mxu1 %v5602_v48  ;;  %4446 = vmatprep.mubr.msk.f32.mxu1 %vm259_vm0, %v2518_v55 }
 0x75e   : > { %4865 = vmatprep.subr.bf16.mxu1 %v5612_v51 }
 0x761   : > { %4867 = vmatpush3.bf16.msra.mxu1 %v5612_v51 }
 0x762   : > { %4869 = vmatprep.subr.bf16.mxu1 %v5624_v57 }
 0x765   : > { %4871 = vmatpush3.bf16.msra.mxu1 %v5624_v57 }
 0x766   : > { %4909 = vmatprep.subr.bf16.mxu1 %v5505_v4 }
 0x768   : > { %4447 = vmatmul.mubr.msk.f32.vlgmr.msra.gmra.mrb[8].mxu1 %vm259_vm0, %v2519_v58 }
 0x769   : > { %4911 = vmatpush3.bf16.msra.mxu1 %v5505_v4 }
 0x76a   : > { %4913 = vmatprep.subr.bf16.mxu1 %v5517_v15 }
 0x76d   : > { %4915 = vmatpush3.bf16.msra.mxu1 %v5517_v15 }
 0x76e   : > { %4917 = vmatprep.subr.bf16.mxu1 %v5528_v63 }
 0x771   : > { %4919 = vmatpush3.bf16.msra.mxu1 %v5528_v63 }
 0x772   : > { %4921 = vmatprep.subr.bf16.mxu1 %v5541_v2 }
 0x83b   : > { %v4448_v61 = vpop.f32.mrb[8].mxu1 }
 0x83c   : > { %v2611_v19 = vmul.f32 %v4448_v61, %v2609_v60  ;;  %v2598_v20 = vpop.f32.mrb[9].mxu1 }
 0x83d   : > { %v2610_v47 = vmul.f32 %v2609_v60, %v2598_v20 }
 0x83e   : > { %v2613_v56 = vsub.f32 %v2337_v31, %v2611_v19  ;;  %v3203_v19 = vstv %s3781_s24 }
 0x83f   : > { %v2612_v59 = vsub.f32 %v2336_v32, %v2610_v47 }
 0x840   : > { %v2615_v9 = vmax.f32 %v2613_v56, 0.0 }
 0x841   : > { %v2614_v12 = vmax.f32 %v2612_v59, 0.0 }
 0x842   : > { %v2617_v22 = vmin.f32 %v2615_v9, 255.0 }
 0x843   : > { %v2616_v0 = vmin.f32 %v2614_v12, 255.0 }
 0x844   : > { %v2621_v1 = vsub.f32 %v2617_v22, %v5545_v13 }
 0x845   : > { %v2620_v3 = vsub.f32 %v2616_v0, %v5547_v44 }
 0x846   : > { %v2624_v5 = vmul.f32 %v2622_v62, %v2621_v1  ;;  %v3216_v1 = vstv %s3800_s25 }
 0x847   : > { %v2623_v6 = vmul.f32 %v2622_v62, %v2620_v3 }
 0x848   : > { %v2626_v38 = vadd.f32 %v2624_v5, %v2617_v22 }
 0x849   : > { %v2625_v7 = vadd.f32 %v2623_v6, %v2616_v0 }
 0x84a   : > { %v2630_v8 = vmul.f32 %v2626_v38, %v5554_v21 }
 0x84b   : > { %v2629_v10 = vmul.f32 %v2625_v7, %v5558_v25 }
 0x84c   : > { %v2634_v41 = vadd.f32 %v2630_v8, %v5561_v26 }
 0x84d   : > { %v2633_v11 = vadd.f32 %v2629_v10, %v5566_v29 }
 0x84e   : > { %2636 = vst.msk [vmem:[#allocation2 + $0x10] sm:$0xff] %vm259_vm0, %v2634_v41 }
 0x84f   : > { %2635 = vst.msk [vmem:[#allocation2 + $0x8] sm:$0xff] %vm259_vm0, %v2633_v11 }
 0x855   : > { %v2646_v13 = vld [vmem:[#allocation2 + $0x10] sm:$0xff] }
 0x856   : > { %v2645_v14 = vld [vmem:[#allocation2 + $0x8] sm:$0xff]  ;;  %v2816_v18 = vld [vmem:[#allocation2 + $0x11] sm:$0xff] }
 0x857   : > { %4461 = vmatprep.mubr.msk.f32.mxu0 %vm259_vm0, %v2645_v14  ;;  %v2637_v44 = vld [vmem:[#allocation2 + $0x7] sm:$0xff]  ;;  %v2638_v16 = vld [vmem:[#allocation2 + $0xf] sm:$0xff] }
 0x858   : > { %4462 = vmatmul.mubr.msk.f32.vlgmr.msra.gmra.mrb[8].mxu0 %vm259_vm0, %v2646_v13  ;;  %v2815_v17 = vld [vmem:[#allocation2 + $0x9] sm:$0xff] }
 0x859   : > { %4887 = vmatpush3.bf16.msra.mxu0 %v5541_v2  ;;  %4476 = vmatprep.mubr.msk.f32.mxu0 %vm259_vm0, %v2637_v44 }
 0x85a   : > { %4889 = vmatprep.subr.bf16.mxu0 %v5579_v36 }
 0x85d   : > { %4891 = vmatpush3.bf16.msra.mxu0 %v5579_v36 }
 0x85e   : > { %4893 = vmatprep.subr.bf16.mxu0 %v5592_v43 }
 0x861   : > { %4895 = vmatpush3.bf16.msra.mxu0 %v5592_v43 }
 0x862   : > { %4897 = vmatprep.subr.bf16.mxu0 %v5602_v48 }
 0x864   : > { %4477 = vmatmul.mubr.msk.f32.vlgmr.msra.gmra.mrb[8].mxu0 %vm259_vm0, %v2638_v16 }
 0x865   : > { %4899 = vmatpush3.bf16.msra.mxu0 %v5602_v48  ;;  %4491 = vmatprep.mubr.msk.f32.mxu0 %vm259_vm0, %v2815_v17 }
 0x866   : > { %4901 = vmatprep.subr.bf16.mxu0 %v5612_v51 }
 0x869   : > { %4903 = vmatpush3.bf16.msra.mxu0 %v5612_v51 }
 0x86a   : > { %4905 = vmatprep.subr.bf16.mxu0 %v5624_v57 }
 0x86d   : > { %4907 = vmatpush3.bf16.msra.mxu0 %v5624_v57 }
 0x86e   : > { %4945 = vmatprep.subr.bf16.mxu0 %v5505_v4 }
 0x870   : > { %4492 = vmatmul.mubr.msk.f32.vlgmr.msra.gmra.mrb[8].mxu0 %vm259_vm0, %v2816_v18 }
 0x871   : > { %4947 = vmatpush3.bf16.msra.mxu0 %v5505_v4 }
 0x872   : > { %4949 = vmatprep.subr.bf16.mxu0 %v5517_v15 }
 0x875   : > { %4951 = vmatpush3.bf16.msra.mxu0 %v5517_v15 }
 0x876   : > { %4953 = vmatprep.subr.bf16.mxu0 %v5528_v63 }
 0x879   : > { %4955 = vmatpush3.bf16.msra.mxu0 %v5528_v63 }
 0x87a   : > { %4957 = vmatprep.subr.bf16.mxu0 %v5541_v2 }
 0x943   : > { %v4493_v24 = vpop.f32.mrb[8].mxu0 }
 0x944   : > { %v2908_v27 = vmul.f32 %v4493_v24, %v2906_v23  ;;  %v2895_v28 = vpop.f32.mrb[9].mxu0 }
 0x945   : > { %v2907_v30 = vmul.f32 %v2906_v23, %v2895_v28 }
 0x946   : > { %v2910_v31 = vsub.f32 %v2634_v41, %v2908_v27 }
 0x947   : > { %v2909_v32 = vsub.f32 %v2633_v11, %v2907_v30 }
 0x948   : > { %v2912_v4 = vmax.f32 %v2910_v31, 0.0 }
 0x949   : > { %v2911_v33 = vmax.f32 %v2909_v32, 0.0 }
 0x94a   : > { %v2914_v34 = vmin.f32 %v2912_v4, 255.0 }
 0x94b   : > { %v2913_v15 = vmin.f32 %v2911_v33, 255.0 }
 0x94c   : > { %v2918_v37 = vsub.f32 %v2914_v34, %v2617_v22 }
 0x94d   : > { %v2917_v39 = vsub.f32 %v2913_v15, %v2616_v0 }
 0x94e   : > { %v2921_v40 = vmul.f32 %v2919_v35, %v2918_v37 }
 0x94f   : > { %v2920_v63 = vmul.f32 %v2919_v35, %v2917_v39 }
 0x950   : > { %v2923_v42 = vadd.f32 %v2921_v40, %v2914_v34 }
 0x951   : > { %v2922_v45 = vadd.f32 %v2920_v63, %v2913_v15 }
 0x952   : > { %v2927_v46 = vmul.f32 %v2923_v42, %v5554_v21 }
 0x953   : > { %v2926_v49 = vmul.f32 %v2922_v45, %v5558_v25 }
 0x954   : > { %v2931_v50 = vadd.f32 %v2927_v46, %v5561_v26 }
 0x955   : > { %v2930_v52 = vadd.f32 %v2926_v49, %v5566_v29 }
 0x956   : > { %2933 = vst.msk [vmem:[#allocation2 + $0x10] sm:$0xff] %vm259_vm0, %v2931_v50 }
 0x957   : > { %2932 = vst.msk [vmem:[#allocation2 + $0x8] sm:$0xff] %vm259_vm0, %v2930_v52 }
 0x95d   : > { %v2943_v54 = vld [vmem:[#allocation2 + $0x10] sm:$0xff] }
 0x95e   : > { %v2942_v53 = vld [vmem:[#allocation2 + $0x8] sm:$0xff]  ;;  %v3113_v61 = vld [vmem:[#allocation2 + $0x11] sm:$0xff] }
 0x95f   : > { %4506 = vmatprep.mubr.msk.f32.mxu1 %vm259_vm0, %v2942_v53  ;;  %v2934_v55 = vld [vmem:[#allocation2 + $0x7] sm:$0xff]  ;;  %v2935_v58 = vld [vmem:[#allocation2 + $0xf] sm:$0xff] }
 0x960   : > { %4507 = vmatmul.mubr.msk.f32.vlgmr.msra.gmra.mrb[10].mxu1 %vm259_vm0, %v2943_v54  ;;  %v3112_v60 = vld [vmem:[#allocation2 + $0x9] sm:$0xff] }
 0x961   : > { %4923 = vmatpush3.bf16.msra.mxu1 %v5541_v2  ;;  %4521 = vmatprep.mubr.msk.f32.mxu1 %vm259_vm0, %v2934_v55 }
 0x962   : > { %4925 = vmatprep.subr.bf16.mxu1 %v5579_v36 }
 0x965   : > { %4927 = vmatpush3.bf16.msra.mxu1 %v5579_v36 }
 0x966   : > { %4929 = vmatprep.subr.bf16.mxu1 %v5592_v43 }
 0x969   : > { %4931 = vmatpush3.bf16.msra.mxu1 %v5592_v43 }
 0x96a   : > { %4933 = vmatprep.subr.bf16.mxu1 %v5602_v48 }
 0x96c   : > { %4522 = vmatmul.mubr.msk.f32.vlgmr.msra.gmra.mrb[10].mxu1 %vm259_vm0, %v2935_v58 }
 0x96d   : > { %4935 = vmatpush3.bf16.msra.mxu1 %v5602_v48  ;;  %4536 = vmatprep.mubr.msk.f32.mxu1 %vm259_vm0, %v3112_v60 }
 0x96e   : > { %4937 = vmatprep.subr.bf16.mxu1 %v5612_v51 }
 0x971   : > { %4939 = vmatpush3.bf16.msra.mxu1 %v5612_v51 }
 0x972   : > { %4941 = vmatprep.subr.bf16.mxu1 %v5624_v57 }
 0x975   : > { %4943 = vmatpush3.bf16.msra.mxu1 %v5624_v57 }
 0x978   : > { %4537 = vmatmul.mubr.msk.f32.vlgmr.msra.gmra.mrb[10].mxu1 %vm259_vm0, %v3113_v61 }
 0xa4b   : > { %v4538_v20 = vpop.f32.mrb[10].mxu1 }
 0xa4c   : > { %v3205_v47 = vmul.f32 %v4538_v20, %v3203_v19  ;;  %v3192_v56 = vpop.f32.mrb[11].mxu1 }
 0xa4d   : > { %v3204_v59 = vmul.f32 %v3203_v19, %v3192_v56 }
 0xa4e   : > { %v3207_v9 = vsub.f32 %v2931_v50, %v3205_v47 }
 0xa4f   : > { %v3206_v12 = vsub.f32 %v2930_v52, %v3204_v59 }
 0xa50   : > { %v3209_v22 = vmax.f32 %v3207_v9, 0.0 }
 0xa51   : > { %v3208_v62 = vmax.f32 %v3206_v12, 0.0 }
 0xa52   : > { %v3211_v0 = vmin.f32 %v3209_v22, 255.0 }
 0xa53   : > { %v3210_v3 = vmin.f32 %v3208_v62, 255.0 }
 0xa54   : > { %v3215_v5 = vsub.f32 %v3211_v0, %v2914_v34 }
 0xa55   : > { %v3214_v6 = vsub.f32 %v3210_v3, %v2913_v15 }
 0xa56   : > { %v3218_v38 = vmul.f32 %v3216_v1, %v3215_v5 }
 0xa57   : > { %v3217_v7 = vmul.f32 %v3216_v1, %v3214_v6 }
 0xa58   : > { %v3220_v8 = vadd.f32 %v3218_v38, %v3211_v0 }
 0xa59   : > { %v3219_v10 = vadd.f32 %v3217_v7, %v3210_v3 }
 0xa5a   : > { %v3224_v41 = vmul.f32 %v3220_v8, %v5554_v21 }
 0xa5b   : > { %v3223_v11 = vmul.f32 %v3219_v10, %v5558_v25 }
 0xa5c   : > { %v3228_v14 = vadd.f32 %v3224_v41, %v5561_v26  ;;  %v3500_v26 = vstv %s3801_s26 }
 0xa5d   : > { %v3227_v13 = vadd.f32 %v3223_v11, %v5566_v29 }
 0xa5e   : > { %3230 = vst.msk [vmem:[#allocation2 + $0x10] sm:$0xff] %vm259_vm0, %v3228_v14 }
 0xa5f   : > { %3229 = vst.msk [vmem:[#allocation2 + $0x8] sm:$0xff] %vm259_vm0, %v3227_v13 }
 0xa65   : > { %v3240_v16 = vld [vmem:[#allocation2 + $0x10] sm:$0xff] }
 0xa66   : > { %v3239_v44 = vld [vmem:[#allocation2 + $0x8] sm:$0xff] }
 0xa67   : > { %4551 = vmatprep.mubr.msk.f32.mxu0 %vm259_vm0, %v3239_v44  ;;  %v3231_v17 = vld [vmem:[#allocation2 + $0x7] sm:$0xff]  ;;  %v3232_v21 = vld [vmem:[#allocation2 + $0xf] sm:$0xff] }
 0xa68   : > { %4552 = vmatmul.mubr.msk.f32.vlgmr.msra.gmra.mrb[10].mxu0 %vm259_vm0, %v3240_v16  ;;  %v3409_v25 = vld [vmem:[#allocation2 + $0x9] sm:$0xff] }
 0xa69   : > { %4959 = vmatpush3.bf16.msra.mxu0 %v5541_v2  ;;  %4566 = vmatprep.mubr.msk.f32.mxu0 %vm259_vm0, %v3231_v17  ;;  %v3410_v2 = vld [vmem:[#allocation2 + $0x11] sm:$0xff] }
 0xa6a   : > { %4961 = vmatprep.subr.bf16.mxu0 %v5579_v36 }
 0xa6d   : > { %4963 = vmatpush3.bf16.msra.mxu0 %v5579_v36 }
 0xa6e   : > { %4965 = vmatprep.subr.bf16.mxu0 %v5592_v43 }
 0xa71   : > { %4967 = vmatpush3.bf16.msra.mxu0 %v5592_v43 }
 0xa72   : > { %4969 = vmatprep.subr.bf16.mxu0 %v5602_v48 }
 0xa74   : > { %4567 = vmatmul.mubr.msk.f32.vlgmr.msra.gmra.mrb[10].mxu0 %vm259_vm0, %v3232_v21 }
 0xa75   : > { %4971 = vmatpush3.bf16.msra.mxu0 %v5602_v48  ;;  %4581 = vmatprep.mubr.msk.f32.mxu0 %vm259_vm0, %v3409_v25 }
 0xa76   : > { %4973 = vmatprep.subr.bf16.mxu0 %v5612_v51 }
 0xa79   : > { %4975 = vmatpush3.bf16.msra.mxu0 %v5612_v51 }
 0xa7a   : > { %4977 = vmatprep.subr.bf16.mxu0 %v5624_v57 }
 0xa7d   : > { %4979 = vmatpush3.bf16.msra.mxu0 %v5624_v57 }
 0xa80   : > { %4582 = vmatmul.mubr.msk.f32.vlgmr.msra.gmra.mrb[10].mxu0 %vm259_vm0, %v3410_v2 }
 0xb53   : > { %v4583_v29 = vpop.f32.mrb[10].mxu0 }
 0xb54   : > { %v3502_v36 = vmul.f32 %v4583_v29, %v3500_v26  ;;  %v3489_v43 = vpop.f32.mrb[11].mxu0 }
 0xb55   : > { %v3501_v48 = vmul.f32 %v3500_v26, %v3489_v43 }
 0xb56   : > { %v3504_v18 = vsub.f32 %v3228_v14, %v3502_v36 }
 0xb57   : > { %v3503_v23 = vsub.f32 %v3227_v13, %v3501_v48 }
 0xb58   : > { %v3506_v24 = vmax.f32 %v3504_v18, 0.0 }
 0xb59   : > { %v3505_v51 = vmax.f32 %v3503_v23, 0.0 }
 0xb5a   : > { %v3508_v27 = vmin.f32 %v3506_v24, 255.0 }
 0xb5b   : > { %v3507_v28 = vmin.f32 %v3505_v51, 255.0 }
 0xb5c   : > { %3510 = vst.msk [vmem:[%s258_s29 + $0x8] sm:$0xff] %vm259_vm0, %v3508_v27 }
 0xb5d   : > { %3509 = vst.msk [vmem:[%s258_s29] sm:$0xff] %vm259_vm0, %v3507_v28 }
 0xb5e PF: > { %s16_s18 = sadd.s32 1, %s5069_s18  }
 0xb5f   : > { %p13_p1 = scmp.ge.s32.totalorder %s16_s18, 4  }
 0xb61   :  { %15 = sbr.rel (!%p13_p1) target bundleno = 1 (0x1), region = 82 }
 0xb68   :  { %3532 = vsyncpa [#allocation4], 1 }
 0xb69   :  { %3534 = vsyncpa [#allocation4 + $0x1], 1 }

</bundles_post_ra>
